<compile_context>
chip_gen: v7x
topology: tpu7x:2x2x1
jax: 0.10.0
libtpu: 0.0.40
codegen_flags: <defaults>
</compile_context>

<pallas_src>
from functools import partial

import jax
import jax.numpy as jnp
from jax import lax
from jax.experimental import pallas as pl
from jax.experimental.pallas import tpu as pltpu

BN_EPS = 1e-5


# --------------------------------------------------------------------------- #
# Pre-pass: fused phi|g 1x1 projection + 2x2 max pool                          #
# --------------------------------------------------------------------------- #
def _pool_proj_kernel(x_ref, wpg_ref, bpg_ref, phi_ref, g_ref):
    """x_ref: (4, ts, C) window slabs -> pooled phi/g tiles (ts, ic)."""
    ic = phi_ref.shape[-1]
    w = wpg_ref[...]

    def proj(k):
        return jnp.dot(x_ref[k].astype(w.dtype), w,
                       preferred_element_type=jnp.float32)

    # 2x2 max pool == max over the 4 window slabs (shared bias added after max),
    # computed slab-wise so only (ts, 2*ic) temps are live, never (N, 2*ic).
    pooled = jnp.maximum(jnp.maximum(proj(0), proj(1)),
                         jnp.maximum(proj(2), proj(3))) + bpg_ref[...]
    phi_ref[...] = pooled[:, :ic].astype(phi_ref.dtype)
    g_ref[...] = pooled[:, ic:].astype(g_ref.dtype)


# --------------------------------------------------------------------------- #
# Main kernel: theta projection, (flash) softmax attention, W conv, residual   #
# --------------------------------------------------------------------------- #
def _attn_kernel(x_ref, phi_ref, g_ref, wth_ref, bth_ref, ww_ref, bw_ref,
                 out_ref, *, tk, nk, approx_recip):
    cdt = phi_ref.dtype
    tq = out_ref.shape[0]
    ic = phi_ref.shape[-1]

    x_t = x_ref[...]                                              # (tq, C)
    theta = (jnp.dot(x_t.astype(cdt), wth_ref[...],
                     preferred_element_type=jnp.float32) + bth_ref[...])
    theta_c = theta.astype(cdt)

    if nk == 1:
        # dense softmax — the whole (tq, Ns) score block fits comfortably
        f = lax.dot_general(theta_c, phi_ref[...], (((1,), (1,)), ((), ())),
                            preferred_element_type=jnp.float32)
        m = jnp.max(f, axis=-1, keepdims=True)
        p = jnp.exp(f - m)
        l = jnp.sum(p, axis=-1, keepdims=True)
        acc = jnp.dot(p.astype(cdt), g_ref[...],
                      preferred_element_type=jnp.float32)
    else:
        # flash-style key chunking: live score footprint is only (tq, tk)
        def body(i, carry):
            m_i, l_i, acc_i = carry
            k0 = pl.multiple_of(i * tk, tk)
            phi_c = phi_ref[pl.ds(k0, tk), :]
            g_c = g_ref[pl.ds(k0, tk), :]
            f = lax.dot_general(theta_c, phi_c, (((1,), (1,)), ((), ())),
                                preferred_element_type=jnp.float32)
            m_new = jnp.maximum(m_i, jnp.max(f, axis=-1, keepdims=True))
            alpha = jnp.exp(m_i - m_new)
            p = jnp.exp(f - m_new)
            l_new = alpha * l_i + jnp.sum(p, axis=-1, keepdims=True)
            acc_new = alpha * acc_i + jnp.dot(p.astype(cdt), g_c,
                                              preferred_element_type=jnp.float32)
            return m_new, l_new, acc_new

        init = (jnp.full((tq, 1), -jnp.inf, jnp.float32),
                jnp.zeros((tq, 1), jnp.float32),
                jnp.zeros((tq, ic), jnp.float32))
        m, l, acc = lax.fori_loop(0, nk, body, init, unroll=nk <= 8)

    y = acc * pl.reciprocal(l, approx=approx_recip)
    # W conv back to C channels (BatchNorm folded into ww/bw host-side).
    wy = (jnp.dot(y.astype(cdt), ww_ref[...],
                  preferred_element_type=jnp.float32) + bw_ref[...])
    out_ref[...] = (wy + x_t.astype(jnp.float32)).astype(out_ref.dtype)


# --------------------------------------------------------------------------- #
# Host-side planning helpers                                                    #
# --------------------------------------------------------------------------- #
def _pick_tile(n, cap):
    """Largest multiple-of-8 divisor of n that is <= cap (fallback: n itself)."""
    cap = max(8, min(int(cap), n))
    for t in range(cap - cap % 8, 7, -8):
        if n % t == 0:
            return t
    return n


def _vmem_limit_bytes():
    """Generation-aware scoped-VMEM limit (~54 MiB on v7x, ~100 MiB on v5e/v6e)."""
    try:
        cap = int(pltpu.get_tpu_info().vmem_capacity_bytes)
    except Exception:
        cap = 128 * 1024 * 1024
    return max(32 << 20, min(int(cap * 0.85), 100 << 20))


# --------------------------------------------------------------------------- #
# Forward                                                                       #
# --------------------------------------------------------------------------- #
@partial(jax.jit, static_argnames=("compute_dtype", "tq", "tk", "ts"))
def nonlocal_forward(x_nchw, params, compute_dtype=jnp.bfloat16,
                     tq=None, tk=None, ts=None):
    """Pallas implementation of NONLocal.forward.  x_nchw: (B, C, H, W)."""
    B, C, H, W = x_nchw.shape
    assert H % 2 == 0 and W % 2 == 0
    N = H * W
    Ns = N // 4
    ic = params["w_theta"].shape[1]
    cdt = jnp.dtype(compute_dtype)
    xdt = x_nchw.dtype

    # ---- host-side weight packing: fuse phi|g, fold BatchNorm into W ------- #
    inv_std = 1.0 / jnp.sqrt(params["bn_var"] + BN_EPS)
    scale = params["bn_gamma"] * inv_std                              # (1, C)
    w_w2 = (params["w_w"] * scale).astype(cdt)                        # (ic, C)
    b_w2 = ((params["b_w"] - params["bn_mean"]) * scale
            + params["bn_beta"]).astype(jnp.float32)
    w_pg = jnp.concatenate([params["w_phi"], params["w_g"]], 1).astype(cdt)
    b_pg = jnp.concatenate([params["b_phi"], params["b_g"]], 1).astype(jnp.float32)
    w_th = params["w_theta"].astype(cdt)
    b_th = params["b_theta"].astype(jnp.float32)
    # TODO(synk): pad ic / C up to multiples of 128 host-side for full MXU width
    # on v6e/v7x (zero-pad projection columns and W-conv rows).

    # ---- layout glue: NCHW -> window-major channels-last ------------------- #
    # TODO(synk): fold these permutations into the kernels (custom index maps /
    # in-kernel transpose) to save two extra HBM passes on v5e/v6e.
    xr = x_nchw.reshape(B, C, H // 2, 2, W // 2, 2)
    x_win = jnp.transpose(xr, (0, 3, 5, 2, 4, 1)).reshape(B, N, C)
    x4 = x_win.reshape(B, 4, Ns, C)

    # ---- generation-aware tiling ------------------------------------------ #
    vmem_limit = _vmem_limit_bytes()
    budget = vmem_limit - (4 << 20)
    csz = cdt.itemsize
    xsz = jnp.dtype(xdt).itemsize

    fixed = 2 * 2 * Ns * ic * csz                       # phi_p + g_p (double buf)
    fixed += 2 * 2 * C * ic * csz + 16 * (ic + C)       # weights + biases

    def per_tile(tq_, tk_):
        b = 4 * tq_ * C * xsz                           # x + out tiles (dbl buf)
        b += 2 * tq_ * tk_ * 4                          # f and p
        b += tq_ * (3 * ic + 2 * C + 8) * 4             # theta / acc / wy / m / l
        return b

    if tk is None:
        tk_cap = min(Ns, 2048)
        while tk_cap > 256 and fixed + per_tile(256, tk_cap) > budget:
            tk_cap //= 2
        tk_eff = _pick_tile(Ns, tk_cap)
    else:
        tk_eff = _pick_tile(Ns, tk)

    if tq is None:
        tq_cap = min(N, 512)
        while tq_cap > 64 and fixed + per_tile(tq_cap, tk_eff) > budget:
            tq_cap //= 2
        tq_eff = _pick_tile(N, tq_cap)
    else:
        tq_eff = _pick_tile(N, tq)

    nk = Ns // tk_eff if Ns % tk_eff == 0 else 1
    if nk == 1:
        tk_eff = Ns

    if ts is None:
        ts_cap = min(Ns, 512)
        while ts_cap > 64 and (8 * ts_cap * C * xsz + 4 * ts_cap * ic * csz
                               + 32 * ts_cap * ic) > budget:
            ts_cap //= 2
        ts_eff = _pick_tile(Ns, ts_cap)
    else:
        ts_eff = _pick_tile(Ns, ts)

    def wspec(a):
        return pl.BlockSpec(a.shape, lambda b, s: (0, 0))

    # ---- pre-pass: pooled phi | g ------------------------------------------ #
    phi_p, g_p = pl.pallas_call(
        _pool_proj_kernel,
        out_shape=(jax.ShapeDtypeStruct((B, Ns, ic), cdt),
                   jax.ShapeDtypeStruct((B, Ns, ic), cdt)),
        grid=(B, Ns // ts_eff),
        in_specs=[pl.BlockSpec((None, 4, ts_eff, C), lambda b, s: (b, 0, s, 0)),
                  wspec(w_pg), wspec(b_pg)],
        out_specs=(pl.BlockSpec((None, ts_eff, ic), lambda b, s: (b, s, 0)),
                   pl.BlockSpec((None, ts_eff, ic), lambda b, s: (b, s, 0))),
        compiler_params=pltpu.CompilerParams(
            dimension_semantics=("parallel", "parallel"),
            vmem_limit_bytes=vmem_limit),
    )(x4, w_pg, b_pg)

    # ---- main pass: attention + W conv + residual --------------------------- #
    kernel = partial(_attn_kernel, tk=tk_eff, nk=nk,
                     approx_recip=(cdt == jnp.dtype(jnp.bfloat16)))

    out = pl.pallas_call(
        kernel,
        out_shape=jax.ShapeDtypeStruct((B, N, C), xdt),
        grid=(B, N // tq_eff),
        in_specs=[pl.BlockSpec((None, tq_eff, C), lambda b, q: (b, q, 0)),  # x tile
                  pl.BlockSpec((None, Ns, ic), lambda b, q: (b, 0, 0)),     # phi
                  pl.BlockSpec((None, Ns, ic), lambda b, q: (b, 0, 0)),     # g
                  wspec(w_th), wspec(b_th), wspec(w_w2), wspec(b_w2)],
        out_specs=pl.BlockSpec((None, tq_eff, C), lambda b, q: (b, q, 0)),
        compiler_params=pltpu.CompilerParams(
            dimension_semantics=("parallel", "parallel"),
            vmem_limit_bytes=vmem_limit),
    )(x_win, phi_p, g_p, w_th, b_th, w_w2, b_w2)

    # ---- layout glue: window-major channels-last -> NCHW -------------------- #
    o = out.reshape(B, 2, 2, H // 2, W // 2, C)
    return jnp.transpose(o, (0, 5, 3, 1, 4, 2)).reshape(B, C, H, W)


# --------------------------------------------------------------------------- #
# Pure-JAX reference (for self-check)                                           #
# --------------------------------------------------------------------------- #
def nonlocal_reference(x_nchw, params):
    B, C, H, W = x_nchw.shape
    N = H * W
    Ns = (H // 2) * (W // 2)
    ic = params["w_theta"].shape[1]

    x_flat = jnp.transpose(x_nchw, (0, 2, 3, 1)).reshape(B, N, C)

    theta = x_flat @ params["w_theta"] + params["b_theta"]
    phi_full = x_flat @ params["w_phi"] + params["b_phi"]
    g_full = x_flat @ params["w_g"] + params["b_g"]

    def pool(a):
        a = a.reshape(B, H // 2, 2, W // 2, 2, ic).max(axis=(2, 4))
        return a.reshape(B, Ns, ic)

    phi_p = pool(phi_full)
    g_p = pool(g_full)

    f = jnp.einsum('bni,bmi->bnm', theta, phi_p)
    f_div_c = jax.nn.softmax(f, axis=-1)
    y = jnp.einsum('bnm,bmi->bni', f_div_c, g_p)

    wy = y @ params["w_w"] + params["b_w"]
    wy_bn = (params["bn_gamma"] * (wy - params["bn_mean"])
             / jnp.sqrt(params["bn_var"] + BN_EPS) + params["bn_beta"])
    z = wy_bn + x_flat
    return jnp.transpose(z.reshape(B, H, W, C), (0, 3, 1, 2))


if __name__ == "__main__":
    key = jax.random.PRNGKey(0)
    B, C, H, W = 2, 4, 16, 16
    in_channels = C
    inter_channels = max(in_channels // 2, 1)

    keys = jax.random.split(key, 9)
    x = jax.random.normal(keys[0], (B, C, H, W), dtype=jnp.float32)

    def conv_init(kw, kb, fan_in, fan_out):
        # PyTorch-style uniform(-1/sqrt(fan_in), 1/sqrt(fan_in)), (in, out) layout
        bound = 1.0 / (fan_in ** 0.5)
        w = jax.random.uniform(kw, (fan_in, fan_out), jnp.float32, -bound, bound)
        b = jax.random.uniform(kb, (1, fan_out), jnp.float32, -bound, bound)
        return w, b

    w_theta, b_theta = conv_init(keys[1], keys[2], in_channels, inter_channels)
    w_phi, b_phi = conv_init(keys[3], keys[4], in_channels, inter_channels)
    w_g, b_g = conv_init(keys[5], keys[6], in_channels, inter_channels)
    w_w, b_w = conv_init(keys[7], keys[8], inter_channels, in_channels)

    params = dict(
        w_theta=w_theta, b_theta=b_theta,
        w_phi=w_phi, b_phi=b_phi,
        w_g=w_g, b_g=b_g,
        w_w=w_w, b_w=b_w,
        # nn.init.constant_(self.W[1].weight, 0); nn.init.constant_(self.W[1].bias, 0)
        # TODO(synk): BatchNorm uses running stats (inference form); with the
        # module's gamma=beta=0 init this matches training mode exactly.
        bn_gamma=jnp.zeros((1, C), jnp.float32),
        bn_beta=jnp.zeros((1, C), jnp.float32),
        bn_mean=jnp.zeros((1, C), jnp.float32),
        bn_var=jnp.ones((1, C), jnp.float32),
    )

    # Self-checks with nonzero BN affine params (so output != x trivially).
    check_params = dict(params)
    check_params["bn_gamma"] = jnp.ones((1, C), jnp.float32)
    check_params["bn_beta"] = 0.1 * jnp.ones((1, C), jnp.float32)

    z_ref = nonlocal_reference(x, check_params)

    # f32 MXU path, multiple query tiles + key chunks (exercises the flash loop)
    z_f32_tiled = jax.block_until_ready(
        nonlocal_forward(x, check_params, compute_dtype=jnp.float32, tq=64, tk=32))
    assert jnp.allclose(z_f32_tiled, z_ref, atol=1e-4, rtol=1e-4)

    # f32 MXU path, auto tiling (dense-softmax single-chunk path)
    z_f32_auto = jax.block_until_ready(
        nonlocal_forward(x, check_params, compute_dtype=jnp.float32))
    assert jnp.allclose(z_f32_auto, z_ref, atol=1e-4, rtol=1e-4)

    # default bf16-MXU / f32-accumulate path: loose (mixed-precision) check
    z_bf16 = jax.block_until_ready(nonlocal_forward(x, check_params))
    rel = jnp.linalg.norm(z_bf16 - z_ref) / jnp.linalg.norm(z_ref)
    assert rel < 5e-2, rel

    # Faithful run (BN gamma/beta == 0 as in the PyTorch module __init__): z == x.
    z = jax.block_until_ready(nonlocal_forward(x, params))
    assert jnp.allclose(z, nonlocal_reference(x, params), atol=1e-5)
    assert z.shape == x.shape

    print("KERNEL_OK")
</pallas_src>

<mosaic_0001>
module attributes {stable_mosaic.version = 11 : i64} {
  func.func @_pool_proj_kernel(%arg0: i32, %arg1: i32, %arg2: memref<1x4x64x4xf32, #tpu.memory_space<vmem>>, %arg3: memref<4x4xf32, #tpu.memory_space<vmem>>, %arg4: memref<1x4xf32, #tpu.memory_space<vmem>>, %arg5: memref<1x64x2xf32, #tpu.memory_space<vmem>>, %arg6: memref<1x64x2xf32, #tpu.memory_space<vmem>>) attributes {dimension_semantics = [#tpu.dimension_semantics<parallel>, #tpu.dimension_semantics<parallel>], iteration_bounds = array<i64: 2, 1>, scalar_prefetch = 0 : i64, scratch_operands = 0 : i64, tpu.core_type = #tpu.core_type<tc>, window_params = [{transform_indices = @transform_0, window_bounds = array<i64: 1, 4, 64, 4>}, {pipeline_mode = #tpu.pipeline_mode<synchronous>, transform_indices = @transform_1, window_bounds = array<i64: 4, 4>}, {pipeline_mode = #tpu.pipeline_mode<synchronous>, transform_indices = @transform_2, window_bounds = array<i64: 1, 4>}, {transform_indices = @transform_3, window_bounds = array<i64: 1, 64, 2>}, {transform_indices = @transform_4, window_bounds = array<i64: 1, 64, 2>}]} {
    %c0 = arith.constant 0 : index
    %c0_0 = arith.constant 0 : index
    %0 = vector.load %arg3[%c0, %c0_0] : memref<4x4xf32, #tpu.memory_space<vmem>>, vector<4x4xf32>
    %c0_1 = arith.constant 0 : index
    %c0_2 = arith.constant 0 : index
    %c0_3 = arith.constant 0 : index
    %c0_4 = arith.constant 0 : index
    %1 = vector.load %arg2[%c0_1, %c0_2, %c0_3, %c0_4] : memref<1x4x64x4xf32, #tpu.memory_space<vmem>>, vector<1x1x64x4xf32>
    %2 = vector.shape_cast %1 : vector<1x1x64x4xf32> to vector<64x4xf32>
    %cst = arith.constant dense<0.000000e+00> : vector<64x4xf32>
    %3 = tpu.matmul %2, %0, %cst {dimension_numbers = #tpu.dot_dimension_numbers<[1], [0], [0], [1], [0, 0, 1, 1], [], []>} : vector<64x4xf32>, vector<4x4xf32>, vector<64x4xf32> -> vector<64x4xf32>
    %c0_5 = arith.constant 0 : index
    %c1 = arith.constant 1 : index
    %c0_6 = arith.constant 0 : index
    %c0_7 = arith.constant 0 : index
    %4 = vector.load %arg2[%c0_5, %c1, %c0_6, %c0_7] : memref<1x4x64x4xf32, #tpu.memory_space<vmem>>, vector<1x1x64x4xf32>
    %5 = vector.shape_cast %4 : vector<1x1x64x4xf32> to vector<64x4xf32>
    %cst_8 = arith.constant dense<0.000000e+00> : vector<64x4xf32>
    %6 = tpu.matmul %5, %0, %cst_8 {dimension_numbers = #tpu.dot_dimension_numbers<[1], [0], [0], [1], [0, 0, 1, 1], [], []>} : vector<64x4xf32>, vector<4x4xf32>, vector<64x4xf32> -> vector<64x4xf32>
    %7 = arith.maximumf %3, %6 : vector<64x4xf32>
    %c0_9 = arith.constant 0 : index
    %c2 = arith.constant 2 : index
    %c0_10 = arith.constant 0 : index
    %c0_11 = arith.constant 0 : index
    %8 = vector.load %arg2[%c0_9, %c2, %c0_10, %c0_11] : memref<1x4x64x4xf32, #tpu.memory_space<vmem>>, vector<1x1x64x4xf32>
    %9 = vector.shape_cast %8 : vector<1x1x64x4xf32> to vector<64x4xf32>
    %cst_12 = arith.constant dense<0.000000e+00> : vector<64x4xf32>
    %10 = tpu.matmul %9, %0, %cst_12 {dimension_numbers = #tpu.dot_dimension_numbers<[1], [0], [0], [1], [0, 0, 1, 1], [], []>} : vector<64x4xf32>, vector<4x4xf32>, vector<64x4xf32> -> vector<64x4xf32>
    %c0_13 = arith.constant 0 : index
    %c3 = arith.constant 3 : index
    %c0_14 = arith.constant 0 : index
    %c0_15 = arith.constant 0 : index
    %11 = vector.load %arg2[%c0_13, %c3, %c0_14, %c0_15] : memref<1x4x64x4xf32, #tpu.memory_space<vmem>>, vector<1x1x64x4xf32>
    %12 = vector.shape_cast %11 : vector<1x1x64x4xf32> to vector<64x4xf32>
    %cst_16 = arith.constant dense<0.000000e+00> : vector<64x4xf32>
    %13 = tpu.matmul %12, %0, %cst_16 {dimension_numbers = #tpu.dot_dimension_numbers<[1], [0], [0], [1], [0, 0, 1, 1], [], []>} : vector<64x4xf32>, vector<4x4xf32>, vector<64x4xf32> -> vector<64x4xf32>
    %14 = arith.maximumf %10, %13 : vector<64x4xf32>
    %15 = arith.maximumf %7, %14 : vector<64x4xf32>
    %c0_17 = arith.constant 0 : index
    %c0_18 = arith.constant 0 : index
    %16 = vector.load %arg4[%c0_17, %c0_18] : memref<1x4xf32, #tpu.memory_space<vmem>>, vector<1x4xf32>
    %17 = vector.broadcast %16 : vector<1x4xf32> to vector<64x4xf32>
    %18 = arith.addf %15, %17 : vector<64x4xf32>
    %19 = vector.extract_strided_slice %18 {offsets = [0, 0], sizes = [64, 2], strides = [1, 1]} : vector<64x4xf32> to vector<64x2xf32>
    %c0_19 = arith.constant 0 : index
    %c0_20 = arith.constant 0 : index
    %c0_21 = arith.constant 0 : index
    %20 = vector.load %arg5[%c0_19, %c0_20, %c0_21] : memref<1x64x2xf32, #tpu.memory_space<vmem>>, vector<1x64x2xf32>
    %21 = vector.shape_cast %20 : vector<1x64x2xf32> to vector<64x2xf32>
    %22 = vector.shape_cast %19 : vector<64x2xf32> to vector<1x64x2xf32>
    tpu.vector_store %arg5[%c0_19, %c0_20, %c0_21], %22 {strides = array<i32>} : memref<1x64x2xf32, #tpu.memory_space<vmem>>, vector<1x64x2xf32>,
    %23 = vector.extract_strided_slice %18 {offsets = [0, 2], sizes = [64, 2], strides = [1, 1]} : vector<64x4xf32> to vector<64x2xf32>
    %c0_22 = arith.constant 0 : index
    %c0_23 = arith.constant 0 : index
    %c0_24 = arith.constant 0 : index
    %24 = vector.load %arg6[%c0_22, %c0_23, %c0_24] : memref<1x64x2xf32, #tpu.memory_space<vmem>>, vector<1x64x2xf32>
    %25 = vector.shape_cast %24 : vector<1x64x2xf32> to vector<64x2xf32>
    %26 = vector.shape_cast %23 : vector<64x2xf32> to vector<1x64x2xf32>
    tpu.vector_store %arg6[%c0_22, %c0_23, %c0_24], %26 {strides = array<i32>} : memref<1x64x2xf32, #tpu.memory_space<vmem>>, vector<1x64x2xf32>,
    return
  }
  func.func @transform_0(%arg0: i32, %arg1: i32) -> (i32, i32, i32, i32) {
    %c0_i32 = arith.constant 0 : i32
    %c0_i32_0 = arith.constant 0 : i32
    %c0_i32_1 = arith.constant 0 : i32
    return %arg0, %c0_i32, %arg1, %c0_i32_0 : i32, i32, i32, i32
  }
  func.func @transform_1(%arg0: i32, %arg1: i32) -> (i32, i32) {
    %c0_i32 = arith.constant 0 : i32
    %c0_i32_0 = arith.constant 0 : i32
    %c0_i32_1 = arith.constant 0 : i32
    return %c0_i32, %c0_i32_0 : i32, i32
  }
  func.func @transform_2(%arg0: i32, %arg1: i32) -> (i32, i32) {
    %c0_i32 = arith.constant 0 : i32
    %c0_i32_0 = arith.constant 0 : i32
    %c0_i32_1 = arith.constant 0 : i32
    return %c0_i32, %c0_i32_0 : i32, i32
  }
  func.func @transform_3(%arg0: i32, %arg1: i32) -> (i32, i32, i32) {
    %c0_i32 = arith.constant 0 : i32
    %c0_i32_0 = arith.constant 0 : i32
    return %arg0, %arg1, %c0_i32 : i32, i32, i32
  }
  func.func @transform_4(%arg0: i32, %arg1: i32) -> (i32, i32, i32) {
    %c0_i32 = arith.constant 0 : i32
    %c0_i32_0 = arith.constant 0 : i32
    return %arg0, %arg1, %c0_i32 : i32, i32, i32
  }
}

module attributes {stable_mosaic.version = 11 : i64} {
  func.func @_attn_kernel(%arg0: i32, %arg1: i32, %arg2: memref<1x64x4xf32, #tpu.memory_space<vmem>>, %arg3: memref<1x64x2xf32, #tpu.memory_space<vmem>>, %arg4: memref<1x64x2xf32, #tpu.memory_space<vmem>>, %arg5: memref<4x2xf32, #tpu.memory_space<vmem>>, %arg6: memref<1x2xf32, #tpu.memory_space<vmem>>, %arg7: memref<2x4xf32, #tpu.memory_space<vmem>>, %arg8: memref<1x4xf32, #tpu.memory_space<vmem>>, %arg9: memref<1x64x4xf32, #tpu.memory_space<vmem>>) attributes {dimension_semantics = [#tpu.dimension_semantics<parallel>, #tpu.dimension_semantics<parallel>], iteration_bounds = array<i64: 2, 4>, scalar_prefetch = 0 : i64, scratch_operands = 0 : i64, tpu.core_type = #tpu.core_type<tc>, window_params = [{transform_indices = @transform_0, window_bounds = array<i64: 1, 64, 4>}, {transform_indices = @transform_1, window_bounds = array<i64: 1, 64, 2>}, {transform_indices = @transform_2, window_bounds = array<i64: 1, 64, 2>}, {pipeline_mode = #tpu.pipeline_mode<synchronous>, transform_indices = @transform_3, window_bounds = array<i64: 4, 2>}, {pipeline_mode = #tpu.pipeline_mode<synchronous>, transform_indices = @transform_4, window_bounds = array<i64: 1, 2>}, {pipeline_mode = #tpu.pipeline_mode<synchronous>, transform_indices = @transform_5, window_bounds = array<i64: 2, 4>}, {pipeline_mode = #tpu.pipeline_mode<synchronous>, transform_indices = @transform_6, window_bounds = array<i64: 1, 4>}, {transform_indices = @transform_7, window_bounds = array<i64: 1, 64, 4>}]} {
    %c0 = arith.constant 0 : index
    %c0_0 = arith.constant 0 : index
    %c0_1 = arith.constant 0 : index
    %0 = vector.load %arg2[%c0, %c0_0, %c0_1] : memref<1x64x4xf32, #tpu.memory_space<vmem>>, vector<1x64x4xf32>
    %1 = vector.shape_cast %0 : vector<1x64x4xf32> to vector<64x4xf32>
    %c0_2 = arith.constant 0 : index
    %c0_3 = arith.constant 0 : index
    %2 = vector.load %arg5[%c0_2, %c0_3] : memref<4x2xf32, #tpu.memory_space<vmem>>, vector<4x2xf32>
    %cst = arith.constant dense<0.000000e+00> : vector<64x2xf32>
    %3 = tpu.matmul %1, %2, %cst {dimension_numbers = #tpu.dot_dimension_numbers<[1], [0], [0], [1], [0, 0, 1, 1], [], []>} : vector<64x4xf32>, vector<4x2xf32>, vector<64x2xf32> -> vector<64x2xf32>
    %c0_4 = arith.constant 0 : index
    %c0_5 = arith.constant 0 : index
    %4 = vector.load %arg6[%c0_4, %c0_5] : memref<1x2xf32, #tpu.memory_space<vmem>>, vector<1x2xf32>
    %5 = vector.broadcast %4 : vector<1x2xf32> to vector<64x2xf32>
    %6 = arith.addf %3, %5 : vector<64x2xf32>
    %cst_6 = arith.constant 0xFF800000 : f32
    %7 = vector.broadcast %cst_6 : f32 to vector<64x1xf32>
    %cst_7 = arith.constant 0.000000e+00 : f32
    %8 = vector.broadcast %cst_7 : f32 to vector<64x1xf32>
    %cst_8 = arith.constant 0.000000e+00 : f32
    %9 = vector.broadcast %cst_8 : f32 to vector<64x2xf32>
    %c0_i32 = arith.constant 0 : i32
    %c32_i32 = arith.constant 32 : i32
    %10 = arith.muli %c0_i32, %c32_i32 : i32
    %11 = tpu.assume_multiple %10, 32 : i32
    %c0_9 = arith.constant 0 : index
    %12 = arith.index_cast %11 : i32 to index
    %c0_10 = arith.constant 0 : index
    %13 = vector.load %arg3[%c0_9, %12, %c0_10] : memref<1x64x2xf32, #tpu.memory_space<vmem>>, vector<1x32x2xf32>
    %14 = vector.shape_cast %13 : vector<1x32x2xf32> to vector<32x2xf32>
    %c0_11 = arith.constant 0 : index
    %15 = arith.index_cast %11 : i32 to index
    %c0_12 = arith.constant 0 : index
    %16 = vector.load %arg4[%c0_11, %15, %c0_12] : memref<1x64x2xf32, #tpu.memory_space<vmem>>, vector<1x32x2xf32>
    %17 = vector.shape_cast %16 : vector<1x32x2xf32> to vector<32x2xf32>
    %cst_13 = arith.constant dense<0.000000e+00> : vector<64x32xf32>
    %18 = tpu.matmul %6, %14, %cst_13 {dimension_numbers = #tpu.dot_dimension_numbers<[1], [1], [0], [0], [0, 0, 1, 0], [], []>} : vector<64x2xf32>, vector<32x2xf32>, vector<64x32xf32> -> vector<64x32xf32>
    %cst_14 = arith.constant dense<0xFF800000> : vector<64xf32>
    %19 = vector.multi_reduction <maximumf>, %18, %cst_14 [1] : vector<64x32xf32> to vector<64xf32>
    %20 = vector.shape_cast %19 : vector<64xf32> to vector<64x1xf32>
    %21 = arith.maximumf %7, %20 : vector<64x1xf32>
    %22 = arith.subf %7, %21 : vector<64x1xf32>
    %23 = math.exp %22 : vector<64x1xf32>
    %24 = vector.broadcast %21 : vector<64x1xf32> to vector<64x32xf32>
    %25 = arith.subf %18, %24 : vector<64x32xf32>
    %26 = math.exp %25 : vector<64x32xf32>
    %27 = arith.mulf %23, %8 : vector<64x1xf32>
    %cst_15 = arith.constant dense<0.000000e+00> : vector<64xf32>
    %28 = vector.multi_reduction <add>, %26, %cst_15 [1] : vector<64x32xf32> to vector<64xf32>
    %29 = vector.shape_cast %28 : vector<64xf32> to vector<64x1xf32>
    %30 = arith.addf %27, %29 : vector<64x1xf32>
    %31 = vector.broadcast %23 : vector<64x1xf32> to vector<64x2xf32>
    %32 = arith.mulf %31, %9 : vector<64x2xf32>
    %cst_16 = arith.constant dense<0.000000e+00> : vector<64x2xf32>
    %33 = tpu.matmul %26, %17, %cst_16 {dimension_numbers = #tpu.dot_dimension_numbers<[1], [0], [0], [1], [0, 0, 1, 1], [], []>} : vector<64x32xf32>, vector<32x2xf32>, vector<64x2xf32> -> vector<64x2xf32>
    %34 = arith.addf %32, %33 : vector<64x2xf32>
    %c1_i32 = arith.constant 1 : i32
    %c32_i32_17 = arith.constant 32 : i32
    %35 = arith.muli %c1_i32, %c32_i32_17 : i32
    %36 = tpu.assume_multiple %35, 32 : i32
    %c0_18 = arith.constant 0 : index
    %37 = arith.index_cast %36 : i32 to index
    %c0_19 = arith.constant 0 : index
    %38 = vector.load %arg3[%c0_18, %37, %c0_19] : memref<1x64x2xf32, #tpu.memory_space<vmem>>, vector<1x32x2xf32>
    %39 = vector.shape_cast %38 : vector<1x32x2xf32> to vector<32x2xf32>
    %c0_20 = arith.constant 0 : index
    %40 = arith.index_cast %36 : i32 to index
    %c0_21 = arith.constant 0 : index
    %41 = vector.load %arg4[%c0_20, %40, %c0_21] : memref<1x64x2xf32, #tpu.memory_space<vmem>>, vector<1x32x2xf32>
    %42 = vector.shape_cast %41 : vector<1x32x2xf32> to vector<32x2xf32>
    %cst_22 = arith.constant dense<0.000000e+00> : vector<64x32xf32>
    %43 = tpu.matmul %6, %39, %cst_22 {dimension_numbers = #tpu.dot_dimension_numbers<[1], [1], [0], [0], [0, 0, 1, 0], [], []>} : vector<64x2xf32>, vector<32x2xf32>, vector<64x32xf32> -> vector<64x32xf32>
    %cst_23 = arith.constant dense<0xFF800000> : vector<64xf32>
    %44 = vector.multi_reduction <maximumf>, %43, %cst_23 [1] : vector<64x32xf32> to vector<64xf32>
    %45 = vector.shape_cast %44 : vector<64xf32> to vector<64x1xf32>
    %46 = arith.maximumf %21, %45 : vector<64x1xf32>
    %47 = arith.subf %21, %46 : vector<64x1xf32>
    %48 = math.exp %47 : vector<64x1xf32>
    %49 = vector.broadcast %46 : vector<64x1xf32> to vector<64x32xf32>
    %50 = arith.subf %43, %49 : vector<64x32xf32>
    %51 = math.exp %50 : vector<64x32xf32>
    %52 = arith.mulf %48, %30 : vector<64x1xf32>
    %cst_24 = arith.constant dense<0.000000e+00> : vector<64xf32>
    %53 = vector.multi_reduction <add>, %51, %cst_24 [1] : vector<64x32xf32> to vector<64xf32>
    %54 = vector.shape_cast %53 : vector<64xf32> to vector<64x1xf32>
    %55 = arith.addf %52, %54 : vector<64x1xf32>
    %56 = vector.broadcast %48 : vector<64x1xf32> to vector<64x2xf32>
    %57 = arith.mulf %56, %34 : vector<64x2xf32>
    %cst_25 = arith.constant dense<0.000000e+00> : vector<64x2xf32>
    %58 = tpu.matmul %51, %42, %cst_25 {dimension_numbers = #tpu.dot_dimension_numbers<[1], [0], [0], [1], [0, 0, 1, 1], [], []>} : vector<64x32xf32>, vector<32x2xf32>, vector<64x2xf32> -> vector<64x2xf32>
    %59 = arith.addf %57, %58 : vector<64x2xf32>
    %c2_i32 = arith.constant 2 : i32
    %60 = tpu.reciprocal %55 : vector<64x1xf32> -> vector<64x1xf32>
    %61 = vector.broadcast %60 : vector<64x1xf32> to vector<64x2xf32>
    %62 = arith.mulf %59, %61 : vector<64x2xf32>
    %c0_26 = arith.constant 0 : index
    %c0_27 = arith.constant 0 : index
    %63 = vector.load %arg7[%c0_26, %c0_27] : memref<2x4xf32, #tpu.memory_space<vmem>>, vector<2x4xf32>
    %cst_28 = arith.constant dense<0.000000e+00> : vector<64x4xf32>
    %64 = tpu.matmul %62, %63, %cst_28 {dimension_numbers = #tpu.dot_dimension_numbers<[1], [0], [0], [1], [0, 0, 1, 1], [], []>} : vector<64x2xf32>, vector<2x4xf32>, vector<64x4xf32> -> vector<64x4xf32>
    %c0_29 = arith.constant 0 : index
    %c0_30 = arith.constant 0 : index
    %65 = vector.load %arg8[%c0_29, %c0_30] : memref<1x4xf32, #tpu.memory_space<vmem>>, vector<1x4xf32>
    %66 = vector.broadcast %65 : vector<1x4xf32> to vector<64x4xf32>
    %67 = arith.addf %64, %66 : vector<64x4xf32>
    %68 = arith.addf %67, %1 : vector<64x4xf32>
    %c0_31 = arith.constant 0 : index
    %c0_32 = arith.constant 0 : index
    %c0_33 = arith.constant 0 : index
    %69 = vector.load %arg9[%c0_31, %c0_32, %c0_33] : memref<1x64x4xf32, #tpu.memory_space<vmem>>, vector<1x64x4xf32>
    %70 = vector.shape_cast %69 : vector<1x64x4xf32> to vector<64x4xf32>
    %71 = vector.shape_cast %68 : vector<64x4xf32> to vector<1x64x4xf32>
    tpu.vector_store %arg9[%c0_31, %c0_32, %c0_33], %71 {strides = array<i32>} : memref<1x64x4xf32, #tpu.memory_space<vmem>>, vector<1x64x4xf32>,
    return
  }
  func.func @transform_0(%arg0: i32, %arg1: i32) -> (i32, i32, i32) {
    %c0_i32 = arith.constant 0 : i32
    %c0_i32_0 = arith.constant 0 : i32
    return %arg0, %arg1, %c0_i32 : i32, i32, i32
  }
  func.func @transform_1(%arg0: i32, %arg1: i32) -> (i32, i32, i32) {
    %c0_i32 = arith.constant 0 : i32
    %c0_i32_0 = arith.constant 0 : i32
    %c0_i32_1 = arith.constant 0 : i32
    return %arg0, %c0_i32, %c0_i32_0 : i32, i32, i32
  }
  func.func @transform_2(%arg0: i32, %arg1: i32) -> (i32, i32, i32) {
    %c0_i32 = arith.constant 0 : i32
    %c0_i32_0 = arith.constant 0 : i32
    %c0_i32_1 = arith.constant 0 : i32
    return %arg0, %c0_i32, %c0_i32_0 : i32, i32, i32
  }
  func.func @transform_3(%arg0: i32, %arg1: i32) -> (i32, i32) {
    %c0_i32 = arith.constant 0 : i32
    %c0_i32_0 = arith.constant 0 : i32
    %c0_i32_1 = arith.constant 0 : i32
    return %c0_i32, %c0_i32_0 : i32, i32
  }
  func.func @transform_4(%arg0: i32, %arg1: i32) -> (i32, i32) {
    %c0_i32 = arith.constant 0 : i32
    %c0_i32_0 = arith.constant 0 : i32
    %c0_i32_1 = arith.constant 0 : i32
    return %c0_i32, %c0_i32_0 : i32, i32
  }
  func.func @transform_5(%arg0: i32, %arg1: i32) -> (i32, i32) {
    %c0_i32 = arith.constant 0 : i32
    %c0_i32_0 = arith.constant 0 : i32
    %c0_i32_1 = arith.constant 0 : i32
    return %c0_i32, %c0_i32_0 : i32, i32
  }
  func.func @transform_6(%arg0: i32, %arg1: i32) -> (i32, i32) {
    %c0_i32 = arith.constant 0 : i32
    %c0_i32_0 = arith.constant 0 : i32
    %c0_i32_1 = arith.constant 0 : i32
    return %c0_i32, %c0_i32_0 : i32, i32
  }
  func.func @transform_7(%arg0: i32, %arg1: i32) -> (i32, i32, i32) {
    %c0_i32 = arith.constant 0 : i32
    %c0_i32_0 = arith.constant 0 : i32
    return %arg0, %arg1, %c0_i32 : i32, i32, i32
  }
}

</mosaic_0001>

<bundles_post_ra>
// kernel: nonlocal_forward.3
= control target key start
LH: loop header
LB: loop body
LE: loop exit
PB: predicated region body
PF: predicated region fallthrough
CT: control target
= control target key end

     0   :  { %s3514_s0 = inlined_call_operand.hbm [shape: f32[2,256,4], index: 0, kind: input, shape index: {}]   ;;  %s3515_s1 = inlined_call_operand.hbm [shape: f32[2,64,2], index: 1, kind: input, shape index: {}]   ;;  %s3516_s2 = inlined_call_operand.hbm [shape: f32[2,64,2], index: 2, kind: input, shape index: {}]   ;;  %s3517_s3 = inlined_call_operand.hbm [shape: f32[4,2], index: 3, kind: input, shape index: {}]   ;;  %s3518_s4 = inlined_call_operand.hbm [shape: f32[1,2], index: 4, kind: input, shape index: {}]   ;;  %s3519_s5 = inlined_call_operand.hbm [shape: f32[2,4], index: 5, kind: input, shape index: {}]   ;;  %s3520_s6 = inlined_call_operand.hbm [shape: f32[1,4], index: 6, kind: input, shape index: {}]   ;;  %s3521_s7 = inlined_call_operand.hbm [shape: f32[2,256,4], index: 7, kind: output, shape index: {}]  }
   0x1   :  { %3549 = sst [smem:[#allocation28_spill]] %s3514_s0 }
   0x2   :  { %3550 = sst [smem:[#allocation29_spill]] %s3515_s1 }
   0x3   :  { %3551 = sst [smem:[#allocation30_spill]] %s3517_s3 }
   0x4   :  { %3552 = sst [smem:[#allocation31_spill]] %s3518_s4 }
   0x5   :  { %3553 = sst [smem:[#allocation32_spill]] %s3519_s5 }
   0x6   :  { %3554 = sst [smem:[#allocation33_spill]] %s3520_s6 }
   0x7   :  { %3555 = sst [smem:[#allocation34_spill]] %s3521_s7 }
   0x8   :  { %12 = vsyncpa [#allocation3], 0 }
   0x9   :  { %14 = vsyncpa [#allocation3 + $0x1], 0 }
   0xa   :  { %15 = vsyncpa [#allocation6], 0 }
   0xb   :  { %17 = vsyncpa [#allocation6 + $0x1], 0 }
   0xc   :  { %18 = vsyncpa [#allocation9], 0 }
   0xd   :  { %19 = vsyncpa [#allocation12], 0 }
   0xe   :  { %20 = vsyncpa [#allocation4], 0 }
   0xf   :  { %22 = vsyncpa [#allocation4 + $0x1], 0  ;;  %s2692_s24 = smov 0   ;;  %s2694_s25 = smov 0  }
  0x10   :  { %s2696_s26 = smov 0   ;;  %s2698_s27 = smov 0  }
  0x11   :  { %s2700_s28 = smov 0   ;;  %s2702_s29 = smov 0  }
  0x12   :  { %s2704_s30 = smov 0   ;;  %s2706_s8 = smov 0  }
  0x13   :  { %s2708_s9 = smov 0   ;;  %s2710_s10 = smov 0  }
  0x14   :  { %s2712_s11 = smov 0  }
  0x15 LB: > { %3556 = sst [smem:[#allocation20_spill]] %s2602_s25  ;;  %s2748_s12 = sadd.s32 4294967295, %s2638_s11   ;;  %s2638_s11 = sphi %s2712_s11, %s28_s11   ;;  %s2634_s10 = sphi %s2710_s10, %s3623_s10   ;;  %s2630_s9 = sphi %s2708_s9, %s3622_s9   ;;  %s2626_s8 = sphi %s2706_s8, %s3621_s8   ;;  %s2622_s30 = sphi %s2704_s30, %s3620_s30   ;;  %s2618_s29 = sphi %s2702_s29, %s3619_s29   ;;  %s2614_s28 = sphi %s2700_s28, %s3618_s28   ;;  %s2610_s27 = sphi %s2698_s27, %s3617_s27   ;;  %s2606_s26 = sphi %s2696_s26, %s3616_s26   ;;  %s2602_s25 = sphi %s2694_s25, %s3613_s25   ;;  %s2598_s24 = sphi %s2692_s24, %s3612_s24  }
  0x16   : > { %3557 = sst [smem:[#allocation21_spill]] %s2606_s26  ;;  %p1748_p0 = scmp.ge.s32.totalorder %s2638_s11, 1 }
  0x17   : > { %3558 = sst [smem:[#allocation22_spill]] %s2622_s30  ;;  %p3523_p1 = scmp.eq.s32.totalorder %s2748_s12, 0 }
  0x18   : > { %3559 = sst [smem:[#allocation23_spill]] %s2626_s8  ;;  %p237_p2 = scmp.lt.s32.totalorder %s2638_s11, 9 }
  0x19   : > { %s2640_s14 = smov [#allocation8]   ;;  %s2641_s16 = smov [#allocation11]  }
  0x1a   : > { %p2753_p3 = pnand %p1748_p0, %p237_p2  ;;  %s250_s15 = sshll.u32 %s2640_s14, 4  ;;  %s251_s15 = int_to_ptr.vmem [resolvable:$true] %s250_s15 }
  0x1b   : > { %s272_s17 = sshll.u32 %s2641_s16, 4  ;;  %s3563_s3 = sld [smem:[#allocation30_spill]]  ;;  %s2759_s17 = int_to_ptr.vmem [resolvable:$true] %s272_s17 }
  0x1c   : > { %s3560_s13 = scalar_select %p2753_p3, 1, 0 }
  0x1d   : > { %p2089_p4 = pneg %p2753_p3 }
  0x1e   : > { %3561 = sst [smem:[#allocation24_spill]] %s3560_s13 }
  0x1f   : > { %p2763_p5 = pnand %p2089_p4, %p3523_p1 }
  0x21   : > { %s3562_s18 = scalar_select %p2763_p5, 1, 0 }
  0x22   : > { %s2302_s21 = scalar_lea.hbm %s3563_s3, 64  ;;  %p2775_p7 = pneg %p2763_p5 }
  0x23   : > { %p2303_p6 = scmp.ne.s32.totalorder %s3563_s3, %s2302_s21  ;;  %p2309_p10 = scmp.lt.u32.totalorder %s2302_s21, %s3563_s3 }
  0x25   : > { %p2305_p8 = pnand %p2775_p7, %p2303_p6 }
  0x27   : > { %p2306_p9 = pneg %p2305_p8 }
  0x29   : > { %p2311_p11 = pnand %p2309_p10, %p2306_p9 }
  0x2b   : > { %2314 = shalt.err (!%p2311_p11)
}
  0x2c   : > { %s2315_s19 = scalar_lea.vmem %s251_s15, 64  ;;  %p2323_p2 = scmp.lt.s32.totalorder %s251_s15, %s251_s15 }
  0x2d   : > { %p2316_p12 = scmp.ne.s32.totalorder %s251_s15, %s2315_s19  ;;  %p2324_p4 = scmp.lt.s32.totalorder %s2315_s19, %s2315_s19 }
  0x2f   : > { %p2318_p13 = pnand %p2316_p12, %p2775_p7  ;;  %p2325_p1 = por %p2324_p4, %p2323_p2 }
  0x31   : > { %p2319_p0 = pneg %p2318_p13 }
  0x33   : > { %p2326_p3 = pnand %p2325_p1, %p2319_p0 }
  0x35   : > { %2329 = shalt.err (!%p2326_p3)
}
  0x36   : > { %2092 = dma.hbm_to_vmem [thread:$0]  (!%p2763_p5), %s3563_s3, 64, %s251_s15, [#allocation9]  }
  0x37   : > { %s3565_s5 = sld [smem:[#allocation32_spill]] }
  0x3d   : > { %s2330_s23 = scalar_lea.hbm %s3565_s5, 32 }
  0x3e   : > { %p2331_p6 = scmp.ne.s32.totalorder %s3565_s5, %s2330_s23  ;;  %p2337_p1 = scmp.lt.u32.totalorder %s2330_s23, %s3565_s5 }
  0x40   : > { %p2333_p8 = pnand %p2331_p6, %p2775_p7 }
  0x42   : > { %p2334_p9 = pneg %p2333_p8 }
  0x44   : > { %p2339_p3 = pnand %p2337_p1, %p2334_p9 }
  0x46   : > { %2342 = shalt.err (!%p2339_p3)
}
  0x47   : > { %s2343_s15 = scalar_lea.vmem %s2759_s17, 32  ;;  %p2351_p13 = scmp.lt.s32.totalorder %s2759_s17, %s2759_s17 }
  0x48   : > { %p2344_p10 = scmp.ne.s32.totalorder %s2759_s17, %s2343_s15  ;;  %p2352_p0 = scmp.lt.s32.totalorder %s2343_s15, %s2343_s15 }
  0x4a   : > { %p2346_p11 = pnand %p2344_p10, %p2775_p7  ;;  %p2353_p2 = por %p2352_p0, %p2351_p13 }
  0x4c   : > { %p2347_p12 = pneg %p2346_p11 }
  0x4e   : > { %p2354_p4 = pnand %p2353_p2, %p2347_p12 }
  0x50   : > { %2357 = shalt.err (!%p2354_p4)
}
  0x51   : > { %2098 = dma.hbm_to_vmem [thread:$0]  (!%p2763_p5), %s3565_s5, 32, %s2759_s17, [#allocation12]  }
  0x52   : > { %p3527_p8 = scmp.eq.s32.totalorder %s2638_s11, 0  ;;  %p82_p9 = scmp.ne.s32.totalorder %s2606_s26, %s2602_s25 }
  0x53   : > { %p88_p1 = scmp.ne.s32.totalorder %s2602_s25, %s2598_s24  ;;  %p3526_p3 = scmp.lt.s32.totalorder %s2638_s11, 8 }
  0x54   : > { %p84_p10 = por %p82_p9, %p3527_p8  ;;  %p3566_p11 = scmp.eq.s32.totalorder %s2748_s12, 0 }
  0x55   : > { %s317_s7 = sand.u32 1, %s2638_s11   ;;  %s319_s21 = sand.u32 1, %s2606_s26  }
  0x56   : > { %p2826_p12 = por %p88_p1, %p3566_p11  ;;  %s2832_s23 = sshll.u32 %s319_s21, 6 }
  0x57   : > { %s3525_s17 = sshll.u32 %s2634_s10, 10  ;;  %s3569_s1 = sld [smem:[#allocation29_spill]] }
  0x58   : > { %s3567_s22 = scalar_select %p2826_p12, 1, 0 }
  0x59   : > { %s321_s24 = scalar_lea.vmem [#allocation5], %s2832_s23  ;;  %p2845_p13 = pnand %p3526_p3, %p84_p10 }
  0x5a   : > { %3568 = sst [smem:[#allocation25_spill]] %s3567_s22  ;;  %s328_s30 = sshll.u32 %s321_s24, 4  ;;  %s2850_s30 = int_to_ptr.vmem [resolvable:$true] %s328_s30 }
  0x5b   : > { %s3570_s8 = scalar_select %p2845_p13, 1, 0 }
  0x5c   : > { %s2852_s20 = scalar_lea.sflag [#allocation6], %s317_s7  ;;  %p3540_p2 = pneg %p2845_p13 }
  0x5d   : > { %s2840_s15 = scalar_lea.hbm %s3569_s1, %s3525_s17  ;;  %3571 = sst [smem:[#allocation26_spill]] %s3570_s8 }
  0x5e   : > { %s2358_s16 = scalar_lea.hbm %s2840_s15, 1024  ;;  %s2363_s17 = scalar_lea.hbm %s3569_s1, 2048 }
  0x5f   : > { %p2359_p0 = scmp.ne.s32.totalorder %s2840_s15, %s2358_s16  ;;  %p2364_p1 = scmp.lt.u32.totalorder %s2840_s15, %s3569_s1 }
  0x60   : > { %p2365_p10 = scmp.lt.u32.totalorder %s2363_s17, %s2358_s16  ;;  %p2367_p3 = scmp.lt.u32.totalorder %s2358_s16, %s2840_s15 }
  0x61   : > { %p2361_p4 = pnand %p3540_p2, %p2359_p0 }
  0x62   : > { %p2366_p11 = por %p2365_p10, %p2364_p1 }
  0x63   : > { %p2362_p9 = pneg %p2361_p4 }
  0x64   : > { %p2368_p6 = por %p2367_p3, %p2366_p11 }
  0x66   : > { %p2369_p8 = pnand %p2368_p6, %p2362_p9 }
  0x68   : > { %2372 = shalt.err (!%p2369_p8)
}
  0x69   : > { %s2373_s7 = scalar_lea.vmem %s2850_s30, 1024  ;;  %s2642_s19 = smov [#allocation5]  }
  0x6a   : > { %p2374_p0 = scmp.ne.s32.totalorder %s2850_s30, %s2373_s7  ;;  %s2378_s24 = sshll.u32 %s2642_s19, 4  ;;  %s2379_s24 = int_to_ptr.vmem [resolvable:$false] %s2378_s24 }
  0x6b   : > { %s2380_s3 = scalar_lea.vmem %s2379_s24, 2048  ;;  %p2381_p5 = scmp.lt.s32.totalorder %s2850_s30, %s2379_s24 }
  0x6c   : > { %p2376_p4 = pnand %p2374_p0, %p3540_p2  ;;  %p2382_p1 = scmp.lt.s32.totalorder %s2380_s3, %s2373_s7 }
  0x6e   : > { %p2377_p12 = pneg %p2376_p4  ;;  %p2383_p10 = por %p2382_p1, %p2381_p5 }
  0x70   : > { %p2384_p3 = pnand %p2383_p10, %p2377_p12 }
  0x72   : > { %2387 = shalt.err (!%p2384_p3)
}
  0x73   : > { %s3543_s5 = smov 128   ;;  %s3545_s17 = smov 8  }
  0x74   : > { %2108 = dma.hbm_to_vmem [thread:$0]  (!%p2845_p13), %s2840_s15, 1024, %s2850_s30, %s2852_s20, %s3543_s5, %s3543_s5, %s3545_s17  }
  0x75   : > { %s3572_s16 = sshll.u32 %s2634_s10, 10  ;;  %s342_s3 = scalar_lea.vmem [#allocation7], %s2832_s23 }
  0x76   : > { %s2888_s24 = scalar_lea.hbm %s3516_s2, %s3572_s16  ;;  %s2891_s21 = sshll.u32 %s342_s3, 4  ;;  %s2991_s21 = int_to_ptr.vmem [resolvable:$true] %s2891_s21 }
  0x77   : > { %s2645_s1 = smov [#allocation10]   ;;  %s3573_s4 = sld [smem:[#allocation31_spill]] }
  0x78   : > { %s261_s22 = sshll.u32 %s2645_s1, 4  ;;  %s262_s22 = int_to_ptr.vmem [resolvable:$true] %s261_s22 }
  0x7d   : > { %s2388_s8 = scalar_lea.hbm %s3573_s4, 16 }
  0x7e   : > { %p2389_p5 = scmp.ne.s32.totalorder %s3573_s4, %s2388_s8  ;;  %p2395_p12 = scmp.lt.u32.totalorder %s2388_s8, %s3573_s4 }
  0x80   : > { %p2391_p6 = pnand %p2389_p5, %p2775_p7 }
  0x82   : > { %p2392_p8 = pneg %p2391_p6 }
  0x84   : > { %p2397_p9 = pnand %p2395_p12, %p2392_p8 }
  0x86   : > { %2400 = shalt.err (!%p2397_p9)
}
  0x87   : > { %s2401_s23 = scalar_lea.vmem %s262_s22, 16  ;;  %s2408_s1 = scalar_lea.vmem %s262_s22, 32 }
  0x88   : > { %p2402_p11 = scmp.ne.s32.totalorder %s262_s22, %s2401_s23  ;;  %p2409_p1 = scmp.lt.s32.totalorder %s262_s22, %s262_s22 }
  0x89   : > { %p2410_p10 = scmp.lt.s32.totalorder %s2408_s1, %s2401_s23 }
  0x8a   : > { %p2404_p0 = pnand %p2402_p11, %p2775_p7 }
  0x8b   : > { %p2411_p3 = por %p2410_p10, %p2409_p1 }
  0x8c   : > { %p2405_p4 = pneg %p2404_p0 }
  0x8e   : > { %p2412_p2 = pnand %p2411_p3, %p2405_p4 }
  0x90   : > { %2415 = shalt.err (!%p2412_p2)
}
  0x91   : > { %p3574_p5 = scmp.ne.s32.totalorder %s3562_s18, 0  ;;  %s2646_s26 = smov [#allocation13]  }
  0x92   : > { %s283_s13 = sshll.u32 %s2646_s26, 4  ;;  %s3575_s6 = sld [smem:[#allocation33_spill]]  ;;  %s284_s13 = int_to_ptr.vmem [resolvable:$true] %s283_s13 }
  0x93   : > { %2095 = dma.hbm_to_vmem [thread:$0]  (!%p3574_p5), %s3573_s4, 16, %s262_s22, [#allocation9]  }
  0x98   : > { %s2416_s19 = scalar_lea.hbm %s3575_s6, 16 }
  0x99   : > { %p2417_p6 = scmp.ne.s32.totalorder %s3575_s6, %s2416_s19  ;;  %p2423_p12 = scmp.lt.u32.totalorder %s2416_s19, %s3575_s6 }
  0x9b   : > { %p2419_p2 = pnand %p2417_p6, %p2775_p7 }
  0x9d   : > { %p2420_p8 = pneg %p2419_p2 }
  0x9f   : > { %p2425_p9 = pnand %p2423_p12, %p2420_p8 }
  0xa1   : > { %2428 = shalt.err (!%p2425_p9)
}
  0xa2   : > { %s2429_s22 = scalar_lea.vmem %s284_s13, 16  ;;  %s2436_s23 = scalar_lea.vmem %s284_s13, 32 }
  0xa3   : > { %p2430_p11 = scmp.ne.s32.totalorder %s284_s13, %s2429_s22  ;;  %p2437_p1 = scmp.lt.s32.totalorder %s284_s13, %s284_s13 }
  0xa4   : > { %p2438_p10 = scmp.lt.s32.totalorder %s2436_s23, %s2429_s22 }
  0xa5   : > { %p2432_p0 = pnand %p2430_p11, %p2775_p7 }
  0xa6   : > { %p2439_p3 = por %p2438_p10, %p2437_p1 }
  0xa7   : > { %p2433_p4 = pneg %p2432_p0 }
  0xa9   : > { %p2440_p13 = pnand %p2439_p3, %p2433_p4 }
  0xab   : > { %2443 = shalt.err (!%p2440_p13)
}
  0xac   : > { %2101 = dma.hbm_to_vmem [thread:$0]  (!%p3574_p5), %s3575_s6, 16, %s284_s13, [#allocation12]  }
  0xad   : > { %s1747_s14 = sadd.s32 4294967294, %s2638_s11   ;;  %s37_s18 = sadd.s32 1, %s2630_s9 }
  0xae   : > { %p38_p7 = scmp.ge.s32.totalorder %s37_s18, 4  ;;  %s49_s25 = sadd.s32 1, %s2618_s29 }
  0xaf   : > { %p56_p13 = scmp.ne.s32.totalorder %s2618_s29, %s2614_s28  ;;  %p62_p6 = scmp.ne.s32.totalorder %s2614_s28, %s2610_s27 }
  0xb0   : > { %s3625_s18 = smov (%p38_p7, %s37_s18), 0  ;;  %s3577_s26 = sadd.s32 1, %s2634_s10 }
  0xb1   : > { %3576 = sst [smem:[#allocation27_spill]] %s3625_s18  ;;  %s3578_s8 = sld [smem:[#allocation21_spill]] }
  0xb2   : > { %s3627_s26 = smov (!%p38_p7, %s3577_s26), %s2634_s10  ;;  %s45_s16 = ssub.s32 %s2630_s9, %s3625_s18 }
  0xb3   : > { %p3579_p2 = scmp.eq.s32.totalorder %s2638_s11, 0  ;;  %p42_p8 = scmp.ge.s32.totalorder %s3627_s26, 2 }
  0xb4   : > { %p3581_p12 = scmp.eq.s32.totalorder %s2748_s12, 0  ;;  %p3583_p11 = scmp.eq.s32.totalorder %s2748_s12, 7 }
  0xb5   : > { %p2945_p5 = por %p3579_p2, %p56_p13  ;;  %p230_p4 = scmp.eq.s32.totalorder %s1747_s14, 7 }
  0xb6   : > { %p2951_p9 = por %p3581_p12, %p62_p6  ;;  %p2957_p0 = por %p3583_p11, %p56_p13 }
  0xb7   : > { %s3629_s26 = smov (%p42_p8, %s3627_s26), 0  ;;  %p2963_p1 = por %p230_p4, %p62_p6 }
  0xb8   : > { %s3584_s7 = scalar_select %p2957_p0, 1, 0 }
  0xb9   : > { %s3585_s3 = scalar_select %p2963_p1, 1, 0 }
  0xba   : > { %s294_s15 = sand.u32 1, %s2618_s29   ;;  %s44_s30 = ssub.s32 %s2634_s10, %s3629_s26 }
  0xbb   : > { %s46_s22 = sor.u32 %s45_s16, %s44_s30  ;;  %p73_p10 = scmp.eq.s32.totalorder %s44_s30, 0 }
  0xbc   : > { %p47_p3 = scmp.eq.s32.totalorder %s46_s22, 0  ;;  %s1754_s23 = sshll.u32 %s294_s15, 6 }
  0xbd   : > { %s3586_s1 = sadd.s32 1, %s3578_s8  ;;  %s1755_s14 = sshll.u32 %s2630_s9, 3 }
  0xbe   : > { %s3631_s8 = smov (!%p73_p10, %s3578_s8), %s3586_s1  ;;  %s1756_s5 = sshll.u32 %s2634_s10, 5 }
  0xbf   : > { %s2976_s0 = scalar_select %p47_p3, %s2618_s29, %s49_s25  }
  0xc0   : > { %s298_s17 = scalar_lea.vmem [#allocation2], %s1754_s23  ;;  %s304_s6 = sadd.s32 %s1756_s5, %s1755_s14 }
  0xc1   : > { %s307_s4 = sshll.u32 %s298_s17, 4  ;;  %s1757_s18 = sshll.u32 %s304_s6, 7  ;;  %s2980_s4 = int_to_ptr.vmem [resolvable:$true] %s307_s4 }
  0xc2   : > { %p3587_p7 = scmp.lt.s32.totalorder %s2638_s11, 8  ;;  %s3589_s22 = sld [smem:[#allocation28_spill]] }
  0xc3   : > { %s2998_s6 = scalar_lea.sflag [#allocation3], %s294_s15 }
  0xc4   : > { %p2986_p13 = pnand %p3587_p7, %p2945_p5 }
  0xc6   : > { %p2446_p2 = pneg %p2986_p13 }
  0xc8   : > { %s2996_s1 = scalar_lea.hbm %s3589_s22, %s1757_s18  ;;  %s2449_s23 = scalar_lea.hbm %s3589_s22, 8192 }
  0xc9   : > { %s2444_s5 = scalar_lea.hbm %s2996_s1, 1024  ;;  %p2450_p12 = scmp.lt.u32.totalorder %s2996_s1, %s3589_s22 }
  0xca   : > { %p2445_p6 = scmp.ne.s32.totalorder %s2996_s1, %s2444_s5  ;;  %p2451_p11 = scmp.lt.u32.totalorder %s2449_s23, %s2444_s5 }
  0xcb   : > { %p2453_p10 = scmp.lt.u32.totalorder %s2444_s5, %s2996_s1 }
  0xcc   : > { %p2447_p5 = pnand %p2446_p2, %p2445_p6  ;;  %p2452_p4 = por %p2451_p11, %p2450_p12 }
  0xce   : > { %p2448_p8 = pneg %p2447_p5  ;;  %p2454_p3 = por %p2453_p10, %p2452_p4 }
  0xd0   : > { %p2455_p7 = pnand %p2454_p3, %p2448_p8 }
  0xd2   : > { %2458 = shalt.err (!%p2455_p7)
}
  0xd3   : > { %s2459_s15 = scalar_lea.vmem %s2980_s4, 1024  ;;  %s2647_s25 = smov [#allocation2]  }
  0xd4   : > { %p2460_p6 = scmp.ne.s32.totalorder %s2980_s4, %s2459_s15  ;;  %s2464_s30 = sshll.u32 %s2647_s25, 4  ;;  %s2465_s30 = int_to_ptr.vmem [resolvable:$false] %s2464_s30 }
  0xd5   : > { %s2466_s17 = scalar_lea.vmem %s2465_s30, 2048  ;;  %p2467_p0 = scmp.lt.s32.totalorder %s2980_s4, %s2465_s30 }
  0xd6   : > { %p2462_p5 = pnand %p2460_p6, %p2446_p2  ;;  %p2468_p12 = scmp.lt.s32.totalorder %s2466_s17, %s2459_s15 }
  0xd8   : > { %p2463_p1 = pneg %p2462_p5  ;;  %p2469_p11 = por %p2468_p12, %p2467_p0 }
  0xda   : > { %p2470_p4 = pnand %p2469_p11, %p2463_p1 }
  0xdc   : > { %2473 = shalt.err (!%p2470_p4)
}
  0xdd   : > { %s3590_s5 = smov 8   ;;  %s3591_s13 = smov 128  }
  0xde   : > { %s3592_s23 = sld [smem:[#allocation26_spill]]  ;;  %s2474_s18 = scalar_lea.hbm %s2888_s24, 1024 }
  0xdf   : > { %2105 = dma.hbm_to_vmem [thread:$0]  (!%p2986_p13), %s2996_s1, 1024, %s2980_s4, %s2998_s6, %s3591_s13, %s3591_s13, %s3590_s5  }
  0xe0   : > { %p2475_p2 = scmp.ne.s32.totalorder %s2888_s24, %s2474_s18  ;;  %s2479_s15 = scalar_lea.hbm %s3516_s2, 2048 }
  0xe1   : > { %p2480_p3 = scmp.lt.u32.totalorder %s2888_s24, %s3516_s2  ;;  %p2481_p7 = scmp.lt.u32.totalorder %s2479_s15, %s2474_s18 }
  0xe2   : > { %p2483_p5 = scmp.lt.u32.totalorder %s2474_s18, %s2888_s24 }
  0xe3   : > { %p2482_p6 = por %p2481_p7, %p2480_p3 }
  0xe4   : > { %p3593_p8 = scmp.ne.s32.totalorder %s3592_s23, 0 }
  0xe5   : > { %p2484_p12 = por %p2483_p5, %p2482_p6 }
  0xe6   : > { %p3594_p0 = pneg %p3593_p8 }
  0xe8   : > { %p2477_p1 = pnand %p2475_p2, %p3594_p0 }
  0xea   : > { %p2478_p10 = pneg %p2477_p1 }
  0xec   : > { %p2485_p11 = pnand %p2484_p12, %p2478_p10 }
  0xee   : > { %2488 = shalt.err (!%p2485_p11)
}
  0xef   : > { %s2489_s4 = scalar_lea.vmem %s2991_s21, 1024  ;;  %p3595_p4 = pmov %p3594_p0 }
  0xf0   : > { %p2490_p13 = scmp.ne.s32.totalorder %s2991_s21, %s2489_s4  ;;  %s2648_s1 = smov [#allocation7]  }
  0xf1   : > { %s2494_s6 = sshll.u32 %s2648_s1, 4  ;;  %s2495_s6 = int_to_ptr.vmem [resolvable:$false] %s2494_s6 }
  0xf2   : > { %p2492_p2 = pnand %p2490_p13, %p3595_p4  ;;  %s2496_s17 = scalar_lea.vmem %s2495_s6, 2048 }
  0xf3   : > { %p2497_p1 = scmp.lt.s32.totalorder %s2991_s21, %s2495_s6  ;;  %p2498_p3 = scmp.lt.s32.totalorder %s2496_s17, %s2489_s4 }
  0xf4   : > { %p2493_p0 = pneg %p2492_p2 }
  0xf5   : > { %p2499_p7 = por %p2498_p3, %p2497_p1 }
  0xf7   : > { %p2500_p6 = pnand %p2499_p7, %p2493_p0 }
  0xf9   : > { %2503 = shalt.err (!%p2500_p6)
}
  0xfa   : > { %2111 = dma.hbm_to_vmem [thread:$0]  (!%p3593_p8), %s2888_s24, 1024, %s2991_s21, %s2852_s20, %s3591_s13, %s3591_s13, %s3590_s5  }
  0xfb   : > { %s3596_s18 = sld [smem:[#allocation24_spill]] }
 0x101   : > { %p3597_p10 = scmp.ne.s32.totalorder %s3596_s18, 0 }
 0x102   : > { %s3059_s14 = sand.u32 (!%p3597_p10), 1, %s2614_s28  }
 0x103   : > { %361 = sbr.rel (%p3597_p10) target bundleno = 1356 (0x54c), region = 48  ;;  %s1765_s16 = sshll.u32 (!%p3597_p10), %s3059_s14, 6 }
 0x104   : > { %s364_s15 = scalar_lea.sflag (!%p3597_p10), [#allocation3], %s3059_s14  ;;  %s3065_s23 = scalar_lea.vmem (!%p3597_p10), [#allocation2], %s1765_s16 }
 0x10a   : > { %2577 = dma.done.wait (%p2951_p9), %s364_s15, 1024  }
 0x10b   : > { %2579 = vsyncadd (%p2951_p9), %s364_s15, 4294966272  ;;  %s3598_s20 = sld [smem:[#allocation20_spill]]  ;;  %s3599_s21 = sld [smem:[#allocation25_spill]] }
 0x10c   : > { %s372_s24 = sand.u32 1, %s2748_s12  }
 0x10d   : > { %s373_s25 = scalar_lea.sflag [#allocation6], %s372_s24 }
 0x111   : > { %s374_s5 = sand.u32 1, %s3598_s20   ;;  %p3600_p8 = scmp.ne.s32.totalorder %s3599_s21, 0 }
 0x112   : > { %s1766_s13 = sshll.u32 %s374_s5, 6 }
 0x113   : > { %s3073_s30 = scalar_lea.vmem [#allocation5], %s1766_s13 }
 0x114   : > { %2581 = dma.done.wait (%p3600_p8), %s373_s25, 2048  }
 0x115   : > { %2583 = vsyncadd (%p3600_p8), %s373_s25, 4294965248  ;;  %s3079_s4 = scalar_lea.vmem [#allocation7], %s1766_s13  ;;  %p3601_p5 = scmp.eq.s32.totalorder %s2748_s12, 0 }
 0x117   : > { %2585 = dma.done.wait (%p3601_p5), [#allocation9], 80   ;;  %p3602_p9 = pmov %p3601_p5 }
 0x118   : > { %p3603_p12 = pmov %p3601_p5 }
 0x119   : > { %2587 = vsyncadd (%p3602_p9), [#allocation9], 4294967216 }
 0x11a   : > { %2589 = dma.done.wait (%p3603_p12), [#allocation12], 48   ;;  %p3604_p11 = pmov %p3601_p5 }
 0x11b   : > { %vm485_vm0 = vcmask 1043456   ;;  %vm460_vm1 = vcmask 31744   ;;  %vm602_vm2 = vcmask 15360   ;;  %v452_v0 = vld [vmem:[#allocation8] sm:$0xf]  ;;  %v3093_v2 = vld [vmem:[%s3065_s23 + $0x8] sm:$0xff] }
 0x11c   : > { %2591 = vsyncadd (%p3604_p11), [#allocation12], 4294967248  ;;  %v3090_v1 = vld [vmem:[%s3065_s23] sm:$0xff]  ;;  %1915 = vmatprep.subr.msk.mxu0 %vm485_vm0, %v452_v0  ;;  %v3098_v3 = vld [vmem:[%s3065_s23 + $0x10] sm:$0xff]  ;;  %vm744_vm4 = vcmask 261120   ;;  %vm1434_vm5 = vcmask 1041408  }
 0x11d   : > { %1917 = vmatprep.mubr.msk.f32.mxu0 %vm460_vm1, %v3090_v1  ;;  %1916 = vmatpush3.msk.msra.mxu0 %vm485_vm0, %v452_v0  ;;  %vm3102_vm3 = vmpackc.low %vm602_vm2, %vm602_vm2  ;;  %v594_v5 = vld [vmem:[%s3073_s30] sm:$0xff]  ;;  %v595_v6 = vld [vmem:[%s3073_s30 + $0x8] sm:$0xff]  ;;  %s3607_s12 = sld [smem:[#allocation22_spill]]  ;;  %s3608_s19 = sld [smem:[#allocation23_spill]] }
 0x11e   : > { %1918 = vmatmul.mubr.msk.f32.vlgmr.msra.gmra.mrb[0].mxu0 %vm460_vm1, %v3093_v2  ;;  %v596_v7 = vld [vmem:[%s3073_s30 + $0x10] sm:$0xff]  ;;  %v3114_v8 = vld [vmem:[%s3065_s23 + $0x18] sm:$0xff]  ;;  %v2023_v9 = vpack.c.bf16 %v595_v6, %v594_v5  ;;  %v3118_v11 = vld [vmem:[%s3065_s23 + $0x20] sm:$0xff]  ;;  %s3419_s1 = scalar_lea.vmem [#allocation14], %s1765_s16  ;;  %s3609_s21 = sld [smem:[#allocation34_spill]] }
 0x11f   : > { %1920 = vmatprep.mubr.msk.f32.mxu0 %vm460_vm1, %v3098_v3  ;;  %v597_v10 = vld [vmem:[%s3073_s30 + $0x18] sm:$0xff]  ;;  %v3129_v13 = vld [vmem:[%s3065_s23 + $0x28] sm:$0xff]  ;;  %v3134_v14 = vld [vmem:[%s3065_s23 + $0x30] sm:$0xff]  ;;  %s1575_s16 = sshll.u32 %s3419_s1, 4  ;;  %s1560_s5 = scalar_lea.sflag [#allocation4], %s3059_s14  ;;  %s3441_s16 = int_to_ptr.vmem [resolvable:$true] %s1575_s16 }
 0x120   : > { %v2029_v12 = vpack.c.bf16 %v597_v10, %v596_v7  ;;  %2025 = vmatprep.subr.msk.bf16.mxu1 %vm3102_vm3, %v2023_v9  ;;  %v3141_v15 = vld [vmem:[%s3065_s23 + $0x38] sm:$0xff]  ;;  %v1803_v16 = vld [vmem:[%s3073_s30 + $0x20] sm:$0xff]  ;;  %v1804_v17 = vld [vmem:[%s3073_s30 + $0x28] sm:$0xff]  ;;  %s2504_s13 = scalar_lea.vmem %s3441_s16, 1024  ;;  %p3610_p4 = scmp.ne.s32.totalorder %s3584_s7, 0 }
 0x121   : > { %2028 = vmatpush3.bf16.xpose.msk.msra.mxu1 %vm3102_vm3, %v2023_v9  ;;  %v2043_v18 = vpack.c.bf16 %v1804_v17, %v1803_v16  ;;  %v1773_v19 = vld [vmem:[#allocation10] ss:$0 sm:$0xff]  ;;  %v1805_v21 = vld [vmem:[%s3073_s30 + $0x30] sm:$0xff]  ;;  %v1806_v22 = vld [vmem:[%s3073_s30 + $0x38] sm:$0xff]  ;;  %p2505_p13 = scmp.ne.s32.totalorder %s3441_s16, %s2504_s13  ;;  %s2649_s25 = smov [#allocation14]  }
 0x122   : > { %1921 = vmatmul.mubr.msk.f32.gmra.mrb[2].mxu0 %vm460_vm1, %v3114_v8  ;;  %2031 = vmatprep.subr.msk.bf16.mxu1 %vm3102_vm3, %v2029_v12  ;;  %v2049_v26 = vpack.c.bf16 %v1806_v22, %v1805_v21  ;;  %v598_v63 = vld [vmem:[%s3079_s4] sm:$0xff]  ;;  %v599_v0 = vld [vmem:[%s3079_s4 + $0x8] sm:$0xff]  ;;  %v600_v16 = vld [vmem:[%s3079_s4 + $0x10] sm:$0xff]  ;;  %s2508_s30 = sshll.u32 %s2649_s25, 4  ;;  %s2509_s30 = int_to_ptr.vmem [resolvable:$false] %s2508_s30 }
 0x123   : > { %1923 = vmatprep.mubr.msk.f32.mxu0 %vm460_vm1, %v3118_v11  ;;  %v2035_v6 = vpack.c.bf16 %v599_v0, %v598_v63  ;;  %v601_v17 = vld [vmem:[%s3079_s4 + $0x18] sm:$0xff]  ;;  %v1807_v21 = vld [vmem:[%s3079_s4 + $0x20] sm:$0xff]  ;;  %v1808_v22 = vld [vmem:[%s3079_s4 + $0x28] sm:$0xff]  ;;  %s1842_s6 = sshll.u32 %s3607_s12, 3  ;;  %s1843_s17 = sshll.u32 %s3608_s19, 5 }
 0x124   : > { %s1572_s18 = sadd.s32 %s1843_s17, %s1842_s6  ;;  %p2506_p2 = pnand %p2505_p13, %p3610_p4 }
 0x125   : > { %2036 = vmatprep.subr.bf16.mxu0 %v2035_v6  ;;  %s1844_s15 = sshll.u32 %s1572_s18, 7  ;;  %p2511_p1 = scmp.lt.s32.totalorder %s3441_s16, %s2509_s30 }
 0x126   : > { %1924 = vmatmul.mubr.msk.f32.gmra.mrb[4].mxu0 %vm460_vm1, %v3129_v13  ;;  %s3447_s24 = scalar_lea.hbm %s3609_s21, %s1844_s15  ;;  %p2507_p0 = pneg %p2506_p2 }
 0x127   : > { %1926 = vmatprep.mubr.msk.f32.mxu0 %vm460_vm1, %v3134_v14  ;;  %2038 = vmatpush3.bf16.msra.mxu0 %v2035_v6 }
 0x129   : > { %2034 = vmatpush3.bf16.xpose.msk.msra.mxu1 %vm3102_vm3, %v2029_v12 }
 0x12a   : > { %1927 = vmatmul.mubr.msk.f32.gmra.mrb[6].mxu0 %vm460_vm1, %v3141_v15  ;;  %2045 = vmatprep.subr.msk.bf16.mxu1 %vm3102_vm3, %v2043_v18 }
 0x1f1   : > { %v1919_v20 = vpop.f32.mrb[0].mxu0 }
 0x1f2   : > { %v555_v23 = vpop.f32.mrb[1].mxu0  ;;  %v561_v25 = vadd.f32 %v1919_v20, %v1773_v19 }
 0x1f3   : > { %v556_v24 = vadd.f32 %v1773_v19, %v555_v23  ;;  %v2055_v23 = vpack.c.bf16 %v1808_v22, %v1807_v21 }
 0x1f5   : > { %v1922_v27 = vpop.f32.mrb[2].mxu0  ;;  %1937 = vmatprep.mubr.msk.f32.mxu1 %vm602_vm2, %v556_v24 }
 0x1f6   : > { %v565_v28 = vpop.f32.mrb[3].mxu0  ;;  %1938 = vmatmul.mubr.msk.f32.vlgmr.msra.gmra.mrb[0].mxu1 %vm602_vm2, %v561_v25  ;;  %v571_v30 = vadd.f32 %v1922_v27, %v1773_v19 }
 0x1f7   : > { %v566_v29 = vadd.f32 %v1773_v19, %v565_v28  ;;  %2048 = vmatpush3.bf16.xpose.msk.msra.mxu1 %vm3102_vm3, %v2043_v18 }
 0x1f8   : > { %2051 = vmatprep.subr.msk.bf16.mxu1 %vm3102_vm3, %v2049_v26 }
 0x1f9   : > { %v1925_v31 = vpop.f32.mrb[4].mxu0  ;;  %1940 = vmatprep.mubr.msk.f32.mxu1 %vm602_vm2, %v566_v29 }
 0x1fa   : > { %v581_v32 = vadd.f32 %v1925_v31, %v1773_v19  ;;  %v575_v33 = vpop.f32.mrb[5].mxu0  ;;  %1941 = vmatmul.mubr.msk.f32.gmra.mrb[2].mxu1 %vm602_vm2, %v571_v30 }
 0x1fb   : > { %v576_v34 = vadd.f32 %v1773_v19, %v575_v33 }
 0x1fd   : > { %v1928_v35 = vpop.f32.mrb[6].mxu0  ;;  %1943 = vmatprep.mubr.msk.f32.mxu1 %vm602_vm2, %v576_v34 }
 0x1fe   : > { %v591_v36 = vadd.f32 %v1928_v35, %v1773_v19  ;;  %v585_v37 = vpop.f32.mrb[7].mxu0  ;;  %1944 = vmatmul.mubr.msk.f32.gmra.mrb[4].mxu1 %vm602_vm2, %v581_v32 }
 0x1ff   : > { %v586_v38 = vadd.f32 %v1773_v19, %v585_v37  ;;  %2054 = vmatpush3.bf16.xpose.msk.msra.mxu1 %vm3102_vm3, %v2049_v26  ;;  %v2039_v19 = vpack.c.bf16 %v601_v17, %v600_v16 }
 0x201   : > { %1946 = vmatprep.mubr.msk.f32.mxu1 %vm602_vm2, %v586_v38  ;;  %2040 = vmatprep.subr.bf16.mxu0 %v2039_v19 }
 0x202   : > { %1947 = vmatmul.mubr.msk.f32.gmra.mrb[6].mxu1 %vm602_vm2, %v591_v36  ;;  %2042 = vmatpush3.bf16.msra.mxu0 %v2039_v19 }
 0x203   : > { %1977 = vmatprep.mubr.msk.f32.mxu1 %vm602_vm2, %v556_v24  ;;  %2056 = vmatprep.subr.bf16.mxu0 %v2055_v23 }
 0x206   : > { %1978 = vmatmul.mubr.msk.f32.vlgmr.msra.gmra.mrb[8].mxu1 %vm602_vm2, %v561_v25 }
 0x207   : > { %1980 = vmatprep.mubr.msk.f32.mxu1 %vm602_vm2, %v566_v29 }
 0x20a   : > { %1981 = vmatmul.mubr.msk.f32.gmra.mrb[10].mxu1 %vm602_vm2, %v571_v30 }
 0x20b   : > { %1983 = vmatprep.mubr.msk.f32.mxu1 %vm602_vm2, %v576_v34 }
 0x20e   : > { %1984 = vmatmul.mubr.msk.f32.gmra.mrb[12].mxu1 %vm602_vm2, %v581_v32 }
 0x20f   : > { %1986 = vmatprep.mubr.msk.f32.mxu1 %vm602_vm2, %v586_v38 }
 0x212   : > { %1987 = vmatmul.mubr.msk.f32.gmra.mrb[14].mxu1 %vm602_vm2, %v591_v36 }
 0x2c9   : > { %v3175_v39 = vpop.f32.mrb[0].mxu1 }
 0x2ca   : > { %v3177_v40 = vpop.f32.mrb[1].mxu1  ;;  %v748_v45 = vsel %vm744_vm4, %v3175_v39, -inf }
 0x2cb   : > { %v745_v41 = vsel %vm744_vm4, %v3177_v40, -inf }
 0x2cc   : > { %746 = vmax.xlane.f32.xlu0 %v745_v41 }
 0x2cd   : > { %v3181_v42 = vpop.f32.mrb[2].mxu1 }
 0x2ce   : > { %v3183_v43 = vpop.f32.mrb[3].mxu1  ;;  %v754_v44 = vsel %vm744_vm4, %v3181_v42, -inf }
 0x2cf   : > { %755 = vmax.xlane.f32.xlu1 %v754_v44  ;;  %v751_v48 = vsel %vm744_vm4, %v3183_v43, -inf }
 0x2d0   : > { %749 = vmax.xlane.f32.xlu0 %v748_v45 }
 0x2d1   : > { %v3189_v46 = vpop.f32.mrb[4].mxu1 }
 0x2d2   : > { %v3191_v47 = vpop.f32.mrb[5].mxu1  ;;  %v760_v52 = vsel %vm744_vm4, %v3189_v46, -inf }
 0x2d3   : > { %752 = vmax.xlane.f32.xlu1 %v751_v48  ;;  %v757_v49 = vsel %vm744_vm4, %v3191_v47, -inf }
 0x2d4   : > { %758 = vmax.xlane.f32.xlu0 %v757_v49  ;;  %v1810_v49 = vld [vmem:[%s3079_s4 + $0x38] sm:$0xff] }
 0x2d5   : > { %v3197_v50 = vpop.f32.mrb[6].mxu1 }
 0x2d6   : > { %v3199_v51 = vpop.f32.mrb[7].mxu1  ;;  %v766_v56 = vsel %vm744_vm4, %v3197_v50, -inf }
 0x2d7   : > { %761 = vmax.xlane.f32.xlu1 %v760_v52  ;;  %v763_v53 = vsel %vm744_vm4, %v3199_v51, -inf }
 0x2d8   : > { %764 = vmax.xlane.f32.xlu0 %v763_v53 }
 0x2d9   : > { %v3205_v54 = vpop.f32.mrb[8].mxu1 }
 0x2da   : > { %v3207_v55 = vpop.f32.mrb[9].mxu1  ;;  %v1124_v60 = vsel %vm744_vm4, %v3205_v54, -inf }
 0x2db   : > { %767 = vmax.xlane.f32.xlu1 %v766_v56  ;;  %v1121_v57 = vsel %vm744_vm4, %v3207_v55, -inf }
 0x2dc   : > { %1122 = vmax.xlane.f32.xlu0 %v1121_v57 }
 0x2dd   : > { %v3213_v58 = vpop.f32.mrb[10].mxu1 }
 0x2de   : > { %v3215_v59 = vpop.f32.mrb[11].mxu1  ;;  %v1130_v5 = vsel %vm744_vm4, %v3213_v58, -inf }
 0x2df   : > { %1125 = vmax.xlane.f32.xlu1 %v1124_v60  ;;  %v1127_v61 = vsel %vm744_vm4, %v3215_v59, -inf }
 0x2e0   : > { %1128 = vmax.xlane.f32.xlu0 %v1127_v61 }
 0x2e1   : > { %v3221_v62 = vpop.f32.mrb[12].mxu1 }
 0x2e2   : > { %v3225_v4 = vpop.f32.mrb[13].mxu1  ;;  %v1136_v12 = vsel %vm744_vm4, %v3221_v62, -inf }
 0x2e3   : > { %1131 = vmax.xlane.f32.xlu1 %v1130_v5  ;;  %v1133_v7 = vsel %vm744_vm4, %v3225_v4, -inf }
 0x2e4   : > { %1134 = vmax.xlane.f32.xlu0 %v1133_v7 }
 0x2e5   : > { %v3231_v9 = vpop.f32.mrb[14].mxu1 }
 0x2e6   : > { %v3233_v10 = vpop.f32.mrb[15].mxu1  ;;  %v1142_v20 = vsel %vm744_vm4, %v3231_v9, -inf }
 0x2e7   : > { %1137 = vmax.xlane.f32.xlu1 %v1136_v12  ;;  %v1139_v18 = vsel %vm744_vm4, %v3233_v10, -inf }
 0x2e8   : > { %1140 = vmax.xlane.f32.xlu0 %v1139_v18 }
 0x2eb   : > { %1143 = vmax.xlane.f32.xlu1 %v1142_v20 }
 0x359   : > { %v3245_v24 = vpop.xlane.xlu0 %746 }
 0x35a   : > { %v793_v25 = vsub.f32 %v3177_v40, %v3245_v24 }
 0x35c   : > { %v801_v26 = vmul.f32 1.442695, %v793_v25  ;;  %v3249_v27 = vpop.xlane.xlu1 %755 }
 0x35d   : > { %v796_v28 = vsub.f32 %v3181_v42, %v3249_v27  ;;  %v3253_v29 = vpop.xlane.xlu0 %749 }
 0x35e   : > { %2222 = vpow2.f32 %v801_v26  ;;  %v794_v30 = vsub.f32 %v3175_v39, %v3253_v29 }
 0x35f   : > { %v807_v31 = vmul.f32 1.442695, %v796_v28 }
 0x360   : > { %v803_v32 = vmul.f32 1.442695, %v794_v30  ;;  %v3257_v33 = vpop.xlane.xlu1 %752 }
 0x361   : > { %v795_v34 = vsub.f32 %v3183_v43, %v3257_v33  ;;  %v3261_v35 = vpop.xlane.xlu0 %758 }
 0x362   : > { %2224 = vpow2.f32 %v803_v32  ;;  %v797_v36 = vsub.f32 %v3191_v47, %v3261_v35  ;;  %v1809_v47 = vld [vmem:[%s3079_s4 + $0x30] sm:$0xff]  ;;  %s2510_s4 = scalar_lea.vmem %s2509_s30, 2048 }
 0x363   : > { %v805_v37 = vmul.f32 1.442695, %v795_v34  ;;  %2226 = vpow2.f32 %v807_v31  ;;  %v2059_v57 = vpack.c.bf16 %v1810_v49, %v1809_v47  ;;  %p2512_p3 = scmp.lt.s32.totalorder %s2510_s4, %s2504_s13 }
 0x364   : > { %v809_v38 = vmul.f32 1.442695, %v797_v36  ;;  %v3265_v40 = vpop.xlane.xlu1 %761 }
 0x365   : > { %2228 = vpow2.f32 %v805_v37  ;;  %v798_v39 = vsub.f32 %v3189_v46, %v3265_v40  ;;  %v3269_v41 = vpop.xlane.xlu0 %764  ;;  %p2513_p7 = por %p2512_p3, %p2511_p1 }
 0x366   : > { %2230 = vpow2.f32 %v809_v38  ;;  %v799_v42 = vsub.f32 %v3199_v51, %v3269_v41 }
 0x367   : > { %v811_v43 = vmul.f32 1.442695, %v798_v39  ;;  %p2514_p6 = pnand %p2513_p7, %p2507_p0 }
 0x368   : > { %v2223_v44 = vpop.eup %2222  ;;  %v813_v45 = vmul.f32 1.442695, %v799_v42  ;;  %v3273_v48 = vpop.xlane.xlu1 %767 }
 0x369   : > { %2232 = vpow2.f32 %v811_v43  ;;  %v800_v52 = vsub.f32 %v3197_v50, %v3273_v48  ;;  %1957 = vmatprep.mubr.msk.f32.mxu0 %vm744_vm4, %v2223_v44  ;;  %v1123_v46 = vpop.xlane.xlu0 %1122  ;;  %v825_v53 = vsel %vm744_vm4, %v2223_v44, 0.0 }
 0x36a   : > { %2234 = vpow2.f32 %v813_v45  ;;  %v3282_v56 = vmax.f32 %v3245_v24, %v1123_v46  ;;  %826 = vadd.xlane.f32.xlu0 %v825_v53 }
 0x36b   : > { %v815_v51 = vmul.f32 1.442695, %v800_v52 }
 0x36c   : > { %v2225_v60 = vpop.eup %2224  ;;  %v1153_v61 = vsub.f32 %v3245_v24, %v3282_v56  ;;  %v1177_v63 = vsub.f32 %v3207_v55, %v3282_v56  ;;  %v1126_v50 = vpop.xlane.xlu1 %1125 }
 0x36d   : > { %2236 = vpow2.f32 %v815_v51  ;;  %v3289_v0 = vmax.f32 %v3253_v29, %v1126_v50  ;;  %1958 = vmatmul.mubr.msk.f32.vlgmr.msra.gmra.mrb[8].mxu0 %vm744_vm4, %v2225_v60  ;;  %v1129_v5 = vpop.xlane.xlu0 %1128  ;;  %v828_v6 = vsel %vm744_vm4, %v2225_v60, 0.0  ;;  %v2227_v7 = vpop.eup %2226 }
 0x36e   : > { %v1185_v12 = vmul.f32 1.442695, %v1177_v63  ;;  %v3294_v16 = vmax.f32 %v3257_v33, %v1129_v5  ;;  %2058 = vmatpush3.bf16.msra.mxu0 %v2055_v23  ;;  %829 = vadd.xlane.f32.xlu1 %v828_v6  ;;  %v834_v28 = vsel %vm744_vm4, %v2227_v7, 0.0 }
 0x36f   : > { %v2229_v17 = vpop.eup %2228  ;;  %v1154_v55 = vsub.f32 %v3253_v29, %v3289_v0  ;;  %v1178_v18 = vsub.f32 %v3205_v54, %v3289_v0  ;;  %2060 = vmatprep.subr.bf16.mxu0 %v2059_v57 }
 0x370   : > { %v2231_v19 = vpop.eup %2230  ;;  %v1155_v20 = vsub.f32 %v3257_v33, %v3294_v16  ;;  %v1179_v21 = vsub.f32 %v3215_v59, %v3294_v16  ;;  %1960 = vmatprep.mubr.msk.f32.mxu0 %vm744_vm4, %v2229_v17  ;;  %v1132_v22 = vpop.xlane.xlu1 %1131  ;;  %v831_v23 = vsel %vm744_vm4, %v2229_v17, 0.0  ;;  %2238 = vpow2.f32 %v1185_v12 }
 0x371   : > { %v1187_v25 = vmul.f32 1.442695, %v1178_v18  ;;  %v3307_v26 = vmax.f32 %v3249_v27, %v1132_v22  ;;  %1961 = vmatmul.mubr.msk.f32.gmra.mrb[10].mxu0 %vm744_vm4, %v2227_v7  ;;  %832 = vadd.xlane.f32.xlu0 %v831_v23  ;;  %v1135_v54 = vpop.xlane.xlu0 %1134  ;;  %v837_v60 = vsel %vm744_vm4, %v2231_v19, 0.0 }
 0x372   : > { %v1189_v30 = vmul.f32 1.442695, %v1179_v21  ;;  %v3312_v31 = vmax.f32 %v3261_v35, %v1135_v54  ;;  %1963 = vmatprep.mubr.msk.f32.mxu0 %vm744_vm4, %v2231_v19  ;;  %835 = vadd.xlane.f32.xlu1 %v834_v28 }
 0x373   : > { %v2233_v59 = vpop.eup %2232  ;;  %v1156_v32 = vsub.f32 %v3249_v27, %v3307_v26  ;;  %v1180_v34 = vsub.f32 %v3213_v58, %v3307_v26  ;;  %2062 = vmatpush3.bf16.msra.mxu0 %v2059_v57  ;;  %2240 = vpow2.f32 %v1187_v25 }
 0x374   : > { %v2235_v36 = vpop.eup %2234  ;;  %v1157_v37 = vsub.f32 %v3261_v35, %v3312_v31  ;;  %v1181_v38 = vsub.f32 %v3225_v4, %v3312_v31  ;;  %v1138_v39 = vpop.xlane.xlu1 %1137  ;;  %v840_v42 = vsel %vm744_vm4, %v2233_v59, 0.0  ;;  %2242 = vpow2.f32 %v1189_v30 }
 0x375   : > { %v1191_v43 = vmul.f32 1.442695, %v1180_v34  ;;  %v3325_v44 = vmax.f32 %v3265_v40, %v1138_v39  ;;  %1964 = vmatmul.mubr.msk.f32.gmra.mrb[12].mxu0 %vm744_vm4, %v2233_v59  ;;  %841 = vadd.xlane.f32.xlu0 %v840_v42  ;;  %v1141_v58 = vpop.xlane.xlu0 %1140  ;;  %v843_v46 = vsel %vm744_vm4, %v2235_v36, 0.0  ;;  %v1402_v39 = vld [vmem:[#allocation11] sm:$0x3]  ;;  %v769_v42 = vsub.f32 -inf, %v3245_v24 }
 0x376   : > { %v1193_v45 = vmul.f32 1.442695, %v1181_v38  ;;  %v3329_v47 = vmax.f32 %v3269_v41, %v1141_v58  ;;  %1966 = vmatprep.mubr.msk.f32.mxu0 %vm744_vm4, %v2235_v36  ;;  %844 = vadd.xlane.f32.xlu1 %v843_v46  ;;  %v1161_v46 = vmul.f32 1.442695, %v1153_v61  ;;  %v1165_v24 = vmul.f32 1.442695, %v1155_v20 }
 0x377   : > { %v2237_v49 = vpop.eup %2236  ;;  %v1158_v4 = vsub.f32 %v3265_v40, %v3325_v44  ;;  %v1182_v52 = vsub.f32 %v3221_v62, %v3325_v44  ;;  %2244 = vpow2.f32 %v1191_v43  ;;  %2063 = vmatprep.subr.msk.mxu1 %vm1434_vm5, %v1402_v39  ;;  %2009 = vmatprep.subr.msk.mxu0 %vm1434_vm5, %v1402_v39  ;;  %v770_v43 = vsub.f32 -inf, %v3253_v29 }
 0x378   : > { %v1159_v53 = vsub.f32 %v3269_v41, %v3329_v47  ;;  %v1183_v51 = vsub.f32 %v3233_v10, %v3329_v47  ;;  %v1144_v57 = vpop.xlane.xlu1 %1143  ;;  %2246 = vpow2.f32 %v1193_v45  ;;  %v846_v7 = vsel %vm744_vm4, %v2237_v49, 0.0  ;;  %2064 = vmatpush3.msk.msra.mxu1 %vm1434_vm5, %v1402_v39 }
 0x379   : > { %v1195_v63 = vmul.f32 1.442695, %v1182_v52  ;;  %v3343_v50 = vmax.f32 %v3273_v48, %v1144_v57  ;;  %838 = vadd.xlane.f32.xlu0 %v837_v60  ;;  %1967 = vmatmul.mubr.msk.f32.gmra.mrb[14].mxu0 %vm744_vm4, %v2237_v49  ;;  %v777_v58 = vmul.f32 1.442695, %v769_v42  ;;  %v771_v45 = vsub.f32 -inf, %v3257_v33 }
 0x37a   : > { %v1197_v62 = vmul.f32 1.442695, %v1183_v51  ;;  %v2239_v5 = vpop.eup %2238  ;;  %v772_v49 = vsub.f32 -inf, %v3249_v27  ;;  %v779_v52 = vmul.f32 1.442695, %v770_v43  ;;  %v774_v51 = vsub.f32 -inf, %v3265_v40 }
 0x37b   : > { %v1160_v6 = vsub.f32 %v3273_v48, %v3343_v50  ;;  %v1184_v10 = vsub.f32 %v3231_v9, %v3343_v50  ;;  %2248 = vpow2.f32 %v1195_v63  ;;  %1997 = vmatprep.mubr.msk.f32.mxu0 %vm744_vm4, %v2239_v5  ;;  %v1209_v28 = vsel %vm744_vm4, %v2239_v5, 0.0 }
 0x37c   : > { %2250 = vpow2.f32 %v1197_v62  ;;  %v781_v57 = vmul.f32 1.442695, %v771_v45  ;;  %v775_v60 = vsub.f32 -inf, %v3269_v41  ;;  %v783_v63 = vmul.f32 1.442695, %v772_v49 }
 0x37d   : > { %v1199_v12 = vmul.f32 1.442695, %v1184_v10  ;;  %847 = vadd.xlane.f32.xlu0 %v846_v7  ;;  %v2241_v17 = vpop.eup %2240  ;;  %v1163_v62 = vmul.f32 1.442695, %v1154_v55  ;;  %v773_v5 = vsub.f32 -inf, %v3261_v35 }
 0x37e   : > { %1998 = vmatmul.mubr.msk.f32.vlgmr.msra.gmra.mrb[16].mxu0 %vm744_vm4, %v2241_v17  ;;  %v2243_v18 = vpop.eup %2242  ;;  %v1212_v34 = vsel %vm744_vm4, %v2241_v17, 0.0  ;;  %v787_v10 = vmul.f32 1.442695, %v774_v51  ;;  %v789_v7 = vmul.f32 1.442695, %v775_v60 }
 0x37f   : > { %2252 = vpow2.f32 %v1199_v12  ;;  %2000 = vmatprep.mubr.msk.f32.mxu0 %vm744_vm4, %v2243_v18  ;;  %v1215_v25 = vsel %vm744_vm4, %v2243_v18, 0.0  ;;  %2010 = vmatpush3.msk.msra.mxu0 %vm1434_vm5, %v1402_v39  ;;  %v1167_v61 = vmul.f32 1.442695, %v1156_v32  ;;  %v776_v12 = vsub.f32 -inf, %v3273_v48 }
 0x380   : > { %2254 = vpow2.f32 %v777_v58  ;;  %v785_v29 = vmul.f32 1.442695, %v773_v5  ;;  %v1171_v0 = vmul.f32 1.442695, %v1158_v4  ;;  %v1173_v32 = vmul.f32 1.442695, %v1159_v53 }
 0x381   : > { %v2245_v19 = vpop.eup %2244  ;;  %2256 = vpow2.f32 %v779_v52  ;;  %v791_v27 = vmul.f32 1.442695, %v776_v12  ;;  %v1169_v40 = vmul.f32 1.442695, %v1157_v37  ;;  %v1175_v41 = vmul.f32 1.442695, %v1160_v6 }
 0x382   : > { %2001 = vmatmul.mubr.msk.f32.gmra.mrb[18].mxu0 %vm744_vm4, %v2245_v19  ;;  %v1218_v9 = vsel %vm744_vm4, %v2245_v19, 0.0  ;;  %v2247_v21 = vpop.eup %2246  ;;  %2258 = vpow2.f32 %v1161_v46 }
 0x383   : > { %1219 = vadd.xlane.f32.xlu1 %v1218_v9  ;;  %2003 = vmatprep.mubr.msk.f32.mxu0 %vm744_vm4, %v2247_v21  ;;  %v1221_v22 = vsel %vm744_vm4, %v2247_v21, 0.0  ;;  %2260 = vpow2.f32 %v781_v57 }
 0x384   : > { %1222 = vadd.xlane.f32.xlu0 %v1221_v22  ;;  %2262 = vpow2.f32 %v783_v63 }
 0x385   : > { %v2249_v23 = vpop.eup %2248  ;;  %2264 = vpow2.f32 %v1163_v62 }
 0x386   : > { %2004 = vmatmul.mubr.msk.f32.gmra.mrb[20].mxu0 %vm744_vm4, %v2249_v23  ;;  %v2251_v54 = vpop.eup %2250  ;;  %v1224_v59 = vsel %vm744_vm4, %v2249_v23, 0.0  ;;  %2266 = vpow2.f32 %v787_v10 }
 0x387   : > { %1216 = vadd.xlane.f32.xlu1 %v1215_v25  ;;  %2006 = vmatprep.mubr.msk.f32.mxu0 %vm744_vm4, %v2251_v54  ;;  %v1227_v36 = vsel %vm744_vm4, %v2251_v54, 0.0  ;;  %2268 = vpow2.f32 %v789_v7 }
 0x388   : > { %1210 = vadd.xlane.f32.xlu0 %v1209_v28  ;;  %2270 = vpow2.f32 %v1165_v24 }
 0x389   : > { %v2253_v30 = vpop.eup %2252  ;;  %2272 = vpow2.f32 %v1167_v61 }
 0x38a   : > { %2007 = vmatmul.mubr.msk.f32.gmra.mrb[22].mxu0 %vm744_vm4, %v2253_v30  ;;  %v1230_v38 = vsel %vm744_vm4, %v2253_v30, 0.0  ;;  %v2255_v56 = vpop.eup %2254  ;;  %2274 = vpow2.f32 %v785_v29 }
 0x38b   : > { %1225 = vadd.xlane.f32.xlu1 %v1224_v59  ;;  %v3390_v55 = vmul.f32 0.0, %v2255_v56  ;;  %v2257_v33 = vpop.eup %2256  ;;  %2276 = vpow2.f32 %v1171_v0 }
 0x38c   : > { %1213 = vadd.xlane.f32.xlu0 %v1212_v34  ;;  %v3393_v26 = vpop.eup %2258  ;;  %v818_v44 = vmul.f32 0.0, %v2257_v33  ;;  %2278 = vpow2.f32 %v791_v27 }
 0x38d   : > { %v2261_v17 = vpop.eup %2260  ;;  %2280 = vpow2.f32 %v1173_v32 }
 0x38e   : > { %v2263_v18 = vpop.eup %2262  ;;  %v819_v22 = vmul.f32 0.0, %v2261_v17  ;;  %2282 = vpow2.f32 %v1169_v40 }
 0x38f   : > { %1228 = vadd.xlane.f32.xlu1 %v1227_v36  ;;  %v2265_v21 = vpop.eup %2264  ;;  %v820_v35 = vmul.f32 0.0, %v2263_v18  ;;  %2284 = vpow2.f32 %v1175_v41 }
 0x390   : > { %v2267_v23 = vpop.eup %2266 }
 0x391   : > { %v2269_v37 = vpop.eup %2268  ;;  %v822_v59 = vmul.f32 0.0, %v2267_v23 }
 0x392   : > { %v2271_v54 = vpop.eup %2270  ;;  %v823_v58 = vmul.f32 0.0, %v2269_v37 }
 0x393   : > { %1231 = vadd.xlane.f32.xlu1 %v1230_v38  ;;  %v2273_v30 = vpop.eup %2272 }
 0x394   : > { %v2275_v36 = vpop.eup %2274 }
 0x395   : > { %v2277_v43 = vpop.eup %2276  ;;  %v821_v50 = vmul.f32 0.0, %v2275_v36 }
 0x396   : > { %v2279_v45 = vpop.eup %2278 }
 0x397   : > { %v2281_v46 = vpop.eup %2280  ;;  %v824_v63 = vmul.f32 0.0, %v2279_v45 }
 0x398   : > { %v2283_v57 = vpop.eup %2282 }
 0x399   : > { %v2285_v7 = vpop.eup %2284 }
 0x3f7   : > { %v827_v16 = vpop.xlane.xlu0 %826 }
 0x3f8   : > { %v849_v20 = vadd.f32 %v827_v16, %v3390_v55 }
 0x3fa   : > { %v1201_v4 = vmul.f32 %v3393_v26, %v849_v20 }
 0x3fb   : > { %v830_v19 = vpop.xlane.xlu1 %829 }
 0x3fc   : > { %v850_v9 = vadd.f32 %v830_v19, %v818_v44 }
 0x3fe   : > { %v833_v47 = vpop.xlane.xlu0 %832  ;;  %v1202_v31 = vmul.f32 %v2265_v21, %v850_v9 }
 0x3ff   : > { %v851_v53 = vadd.f32 %v833_v47, %v819_v22  ;;  %v836_v25 = vpop.xlane.xlu1 %835 }
 0x400   : > { %v852_v28 = vadd.f32 %v836_v25, %v820_v35 }
 0x401   : > { %v1203_v34 = vmul.f32 %v2271_v54, %v851_v53 }
 0x402   : > { %v842_v38 = vpop.xlane.xlu0 %841  ;;  %v1204_v39 = vmul.f32 %v2273_v30, %v852_v28 }
 0x403   : > { %v854_v42 = vadd.f32 %v842_v38, %v822_v59  ;;  %v845_v48 = vpop.xlane.xlu1 %844 }
 0x404   : > { %v855_v49 = vadd.f32 %v845_v48, %v823_v58 }
 0x405   : > { %v1206_v6 = vmul.f32 %v2277_v43, %v854_v42 }
 0x406   : > { %v839_v52 = vpop.xlane.xlu0 %838  ;;  %v1207_v60 = vmul.f32 %v2281_v46, %v855_v49 }
 0x407   : > { %v853_v51 = vadd.f32 %v839_v52, %v821_v50 }
 0x409   : > { %v1205_v62 = vmul.f32 %v2283_v57, %v853_v51 }
 0x40a   : > { %v848_v5 = vpop.xlane.xlu0 %847 }
 0x40b   : > { %v856_v10 = vadd.f32 %v848_v5, %v824_v63 }
 0x40d   : > { %v1208_v24 = vmul.f32 %v2285_v7, %v856_v10 }
 0x410   : > { %v1220_v56 = vpop.xlane.xlu1 %1219 }
 0x411   : > { %v1223_v61 = vpop.xlane.xlu0 %1222  ;;  %v1236_v38 = vadd.f32 %v1220_v56, %v1204_v39 }
 0x414   : > { %v1217_v12 = vpop.xlane.xlu1 %1216 }
 0x415   : > { %v1211_v29 = vpop.xlane.xlu0 %1210  ;;  %v1235_v42 = vadd.f32 %v1217_v12, %v1203_v34 }
 0x416   : > { %v1233_v47 = vadd.f32 %v1211_v29, %v1201_v4  ;;  %v1237_v4 = vadd.f32 %v1223_v61, %v1205_v62 }
 0x418   : > { %v1226_v27 = vpop.xlane.xlu1 %1225 }
 0x419   : > { %v1214_v32 = vpop.xlane.xlu0 %1213 }
 0x41a   : > { %v1234_v23 = vadd.f32 %v1214_v32, %v1202_v31  ;;  %v1238_v31 = vadd.f32 %v1226_v27, %v1206_v6 }
 0x41c   : > { %v1229_v28 = vpop.xlane.xlu1 %1228  ;;  %2286 = vrcp.f32 %v1234_v23 }
 0x41d   : > { %2288 = vrcp.f32 %v1233_v47 }
 0x41e   : > { %2290 = vrcp.f32 %v1236_v38 }
 0x41f   : > { %2292 = vrcp.f32 %v1235_v42 }
 0x420   : > { %2294 = vrcp.f32 %v1238_v31 }
 0x421   : > { %2296 = vrcp.f32 %v1237_v4 }
 0x440   : > { %v1959_v0 = vpop.f32.mrb[8].mxu0 }
 0x441   : > { %v987_v33 = vadd.f32 %v1959_v0, %v818_v44  ;;  %v947_v16 = vpop.f32.mrb[9].mxu0 }
 0x442   : > { %v986_v20 = vadd.f32 %v947_v16, %v3390_v55 }
 0x443   : > { %v1242_v17 = vmul.f32 %v2265_v21, %v987_v33 }
 0x444   : > { %v1962_v40 = vpop.f32.mrb[10].mxu0  ;;  %v1241_v18 = vmul.f32 %v3393_v26, %v986_v20 }
 0x445   : > { %v989_v19 = vadd.f32 %v1962_v40, %v820_v35  ;;  %v957_v9 = vpop.f32.mrb[11].mxu0 }
 0x446   : > { %v988_v41 = vadd.f32 %v957_v9, %v819_v22 }
 0x447   : > { %v1244_v37 = vmul.f32 %v2273_v30, %v989_v19  ;;  %v1232_v30 = vpop.xlane.xlu1 %1231 }
 0x448   : > { %v1965_v53 = vpop.f32.mrb[12].mxu0  ;;  %v1243_v25 = vmul.f32 %v2271_v54, %v988_v41  ;;  %v1831_v41 = vld [vmem:[#allocation13] ss:$0 sm:$0xff] }
 0x449   : > { %v991_v36 = vadd.f32 %v1965_v53, %v822_v59  ;;  %v967_v44 = vpop.f32.mrb[13].mxu0  ;;  %v1240_v59 = vadd.f32 %v1232_v30, %v1208_v24 }
 0x44a   : > { %v990_v55 = vadd.f32 %v967_v44, %v821_v50  ;;  %v1239_v50 = vadd.f32 %v1229_v28, %v1207_v60 }
 0x44b   : > { %v1246_v21 = vmul.f32 %v2277_v43, %v991_v36  ;;  %v2287_v43 = vpop.eup %2286  ;;  %2298 = vrcp.f32 %v1240_v59 }
 0x44c   : > { %v1968_v48 = vpop.f32.mrb[14].mxu0  ;;  %v1245_v45 = vmul.f32 %v2283_v57, %v990_v55  ;;  %v2289_v57 = vpop.eup %2288  ;;  %2300 = vrcp.f32 %v1239_v50 }
 0x44d   : > { %v993_v26 = vadd.f32 %v1968_v48, %v824_v63  ;;  %v977_v35 = vpop.f32.mrb[15].mxu0  ;;  %v2291_v10 = vpop.eup %2290 }
 0x44e   : > { %v992_v22 = vadd.f32 %v977_v35, %v823_v58 }
 0x44f   : > { %v1248_v54 = vmul.f32 %v2285_v7, %v993_v26 }
 0x450   : > { %v1247_v49 = vmul.f32 %v2281_v46, %v992_v22  ;;  %v2293_v46 = vpop.eup %2292 }
 0x451   : > { %v1999_v39 = vpop.f32.mrb[16].mxu0  ;;  %v2295_v29 = vpop.eup %2294 }
 0x452   : > { %v1379_v34 = vadd.f32 %v1999_v39, %v1242_v17  ;;  %v1339_v52 = vpop.f32.mrb[17].mxu0  ;;  %v2297_v33 = vpop.eup %2296 }
 0x453   : > { %v1378_v51 = vadd.f32 %v1339_v52, %v1241_v18 }
 0x454   : > { %v1395_v63 = vmul.f32 %v2287_v43, %v1379_v34 }
 0x455   : > { %v1394_v5 = vmul.f32 %v2289_v57, %v1378_v51  ;;  %v2002_v6 = vpop.f32.mrb[18].mxu0  ;;  %v2299_v40 = vpop.eup %2298 }
 0x456   : > { %v1381_v58 = vadd.f32 %v2002_v6, %v1244_v37  ;;  %v1349_v62 = vpop.f32.mrb[19].mxu0  ;;  %v2301_v19 = vpop.eup %2300 }
 0x457   : > { %v1380_v7 = vadd.f32 %v1349_v62, %v1243_v25  ;;  %2011 = vmatprep.mubr.msk.f32.mxu0 %vm602_vm2, %v1394_v5 }
 0x458   : > { %v1397_v24 = vmul.f32 %v2291_v10, %v1381_v58  ;;  %2012 = vmatmul.mubr.msk.f32.vlgmr.msra.gmra.mrb[24].mxu0 %vm602_vm2, %v1395_v63 }
 0x459   : > { %v1396_v60 = vmul.f32 %v2293_v46, %v1380_v7  ;;  %v2005_v56 = vpop.f32.mrb[20].mxu0 }
 0x45a   : > { %v1383_v61 = vadd.f32 %v2005_v56, %v1246_v21  ;;  %v1359_v12 = vpop.f32.mrb[21].mxu0 }
 0x45b   : > { %v1382_v0 = vadd.f32 %v1359_v12, %v1245_v45  ;;  %2014 = vmatprep.mubr.msk.f32.mxu1 %vm602_vm2, %v1396_v60 }
 0x45c   : > { %v1399_v16 = vmul.f32 %v2295_v29, %v1383_v61  ;;  %2015 = vmatmul.mubr.msk.f32.vlgmr.msra.gmra.mrb[16].mxu1 %vm602_vm2, %v1397_v24 }
 0x45d   : > { %v1398_v20 = vmul.f32 %v2297_v33, %v1382_v0  ;;  %v2008_v27 = vpop.f32.mrb[22].mxu0 }
 0x45e   : > { %v1385_v32 = vadd.f32 %v2008_v27, %v1248_v54  ;;  %v1369_v17 = vpop.f32.mrb[23].mxu0 }
 0x45f   : > { %v1384_v18 = vadd.f32 %v1369_v17, %v1247_v49  ;;  %2017 = vmatprep.mubr.msk.f32.mxu1 %vm602_vm2, %v1398_v20 }
 0x460   : > { %v1401_v9 = vmul.f32 %v2299_v40, %v1385_v32  ;;  %2018 = vmatmul.mubr.msk.f32.gmra.mrb[18].mxu1 %vm602_vm2, %v1399_v16 }
 0x461   : > { %v1400_v23 = vmul.f32 %v2301_v19, %v1384_v18 }
 0x463   : > { %2020 = vmatprep.mubr.msk.f32.mxu1 %vm602_vm2, %v1400_v23 }
 0x464   : > { %2021 = vmatmul.mubr.msk.f32.gmra.mrb[20].mxu1 %vm602_vm2, %v1401_v9 }
 0x52b   : > { %v2013_v47 = vpop.f32.mrb[24].mxu0 }
 0x52c   : > { %v1510_v37 = vadd.f32 %v2013_v47, %v1831_v41  ;;  %v1504_v53 = vpop.f32.mrb[25].mxu0 }
 0x52d   : > { %v1505_v25 = vadd.f32 %v1831_v41, %v1504_v53 }
 0x52e   : > { %v1544_v28 = vadd.f32 %v1510_v37, %v3093_v2 }
 0x52f   : > { %v1543_v36 = vadd.f32 %v1505_v25, %v3090_v1  ;;  %v2016_v44 = vpop.f32.mrb[16].mxu1 }
 0x530   : > { %1552 = vst.msk [vmem:[%s3419_s1 + $0x8] sm:$0xff] %vm460_vm1, %v1544_v28  ;;  %v1520_v38 = vadd.f32 %v2016_v44, %v1831_v41  ;;  %v1514_v55 = vpop.f32.mrb[17].mxu1 }
 0x531   : > { %1551 = vst.msk [vmem:[%s3419_s1] sm:$0xff] %vm460_vm1, %v1543_v36  ;;  %v1515_v42 = vadd.f32 %v1831_v41, %v1514_v55 }
 0x532   : > { %v1546_v2 = vadd.f32 %v1520_v38, %v3114_v8 }
 0x533   : > { %v1545_v1 = vadd.f32 %v1515_v42, %v3098_v3  ;;  %v2019_v21 = vpop.f32.mrb[18].mxu1 }
 0x534   : > { %1554 = vst.msk [vmem:[%s3419_s1 + $0x18] sm:$0xff] %vm460_vm1, %v1546_v2  ;;  %v1530_v48 = vadd.f32 %v2019_v21, %v1831_v41  ;;  %v1524_v45 = vpop.f32.mrb[19].mxu1 }
 0x535   : > { %1553 = vst.msk [vmem:[%s3419_s1 + $0x10] sm:$0xff] %vm460_vm1, %v1545_v1  ;;  %v1525_v26 = vadd.f32 %v1831_v41, %v1524_v45 }
 0x536   : > { %v1548_v35 = vadd.f32 %v1530_v48, %v3129_v13 }
 0x537   : > { %v1547_v8 = vadd.f32 %v1525_v26, %v3118_v11  ;;  %v2022_v31 = vpop.f32.mrb[20].mxu1 }
 0x538   : > { %1556 = vst.msk [vmem:[%s3419_s1 + $0x28] sm:$0xff] %vm460_vm1, %v1548_v35  ;;  %v1540_v3 = vadd.f32 %v2022_v31, %v1831_v41  ;;  %v1534_v22 = vpop.f32.mrb[21].mxu1 }
 0x539   : > { %1555 = vst.msk [vmem:[%s3419_s1 + $0x20] sm:$0xff] %vm460_vm1, %v1547_v8  ;;  %v1535_v4 = vadd.f32 %v1831_v41, %v1534_v22 }
 0x53a   : > { %v1550_v30 = vadd.f32 %v1540_v3, %v3141_v15 }
 0x53b   : > { %v1549_v11 = vadd.f32 %v1535_v4, %v3134_v14 }
 0x53c   : > { %1558 = vst.msk [vmem:[%s3419_s1 + $0x38] sm:$0xff] %vm460_vm1, %v1550_v30 }
 0x53d   : > { %1557 = vst.msk [vmem:[%s3419_s1 + $0x30] sm:$0xff] %vm460_vm1, %v1549_v11 }
 0x53e   : > { %2517 = shalt.err (!%p2514_p6)
}
 0x53f   : > { %s2518_s12 = scalar_lea.hbm %s3447_s24, 1024  ;;  %s2522_s6 = scalar_lea.hbm %s3609_s21, 8192 }
 0x540   : > { %p2519_p10 = scmp.ne.s32.totalorder %s3447_s24, %s2518_s12  ;;  %p2523_p9 = scmp.lt.u32.totalorder %s3447_s24, %s3609_s21 }
 0x541   : > { %p2524_p12 = scmp.lt.u32.totalorder %s2522_s6, %s2518_s12  ;;  %p2526_p13 = scmp.lt.u32.totalorder %s2518_s12, %s3447_s24 }
 0x542   : > { %p2520_p8 = pnand %p2519_p10, %p3610_p4 }
 0x543   : > { %p2525_p11 = por %p2524_p12, %p2523_p9 }
 0x544   : > { %p2521_p5 = pneg %p2520_p8 }
 0x545   : > { %p2527_p2 = por %p2526_p13, %p2525_p11 }
 0x547   : > { %p2528_p0 = pnand %p2527_p2, %p2521_p5 }
 0x549   : > { %2531 = shalt.err (!%p2528_p0)
}
 0x54a   : > { %s2650_s15 = smov 128   ;;  %s2651_s23 = smov 8  }
 0x54b   : > { %2087 = dma.vmem_to_hbm [thread:$0]  (%p3610_p4), %s3441_s16, 1024, %s3447_s24, %s1560_s5, %s2650_s15, %s2650_s15, %s2651_s23  }
 0x54c PF: > { %p2125_p1 = scmp.ge.s32.totalorder %s2638_s11, 2  ;;  %s1590_s20 = sand.u32 1, %s2610_s27  }
 0x54d   : > { %p3611_p3 = scmp.ne.s32.totalorder %s3585_s3, 0  ;;  %s1591_s13 = scalar_lea.sflag [#allocation4], %s1590_s20 }
 0x54f   : > { %p2113_p7 = pnand %p2125_p1, %p3611_p3 }
 0x551   : > { %2593 = dma.done.wait (!%p2113_p7), %s1591_s13, 1024  }
 0x552   : > { %2595 = vsyncadd (!%p2113_p7), %s1591_s13, 4294966272  ;;  %s28_s11 = sadd.s32 1, %s2638_s11   ;;  %s3612_s24 = sld [smem:[#allocation20_spill]] }
 0x553   : > { %p25_p6 = scmp.ge.s32.totalorder %s28_s11, 10   ;;  %s3613_s25 = sld [smem:[#allocation21_spill]] }
 0x554   : > { %s3614_s7 = sld [smem:[#allocation27_spill]]  ;;  %s3615_s14 = smov %s3629_s26 }
 0x555   : > { %s3616_s26 = smov %s3631_s8  ;;  %s3617_s27 = smov %s2614_s28 }
 0x556   : > { %s3618_s28 = smov %s2618_s29  ;;  %s3619_s29 = smov %s2976_s0 }
 0x557   : > { %s3620_s30 = smov %s2630_s9  ;;  %s3621_s8 = smov %s2634_s10 }
 0x558   : > { %s3623_s10 = smov %s3615_s14  ;;  %27 = sbr.rel (!%p25_p6) target bundleno = 21 (0x15), region = 135 }
 0x55a   : > { %s3622_s9 = smov %s3614_s7 }
 0x55f   :  { %1596 = vsyncpa [#allocation3], 1 }
 0x560   :  { %1598 = vsyncpa [#allocation3 + $0x1], 1 }
 0x561   :  { %1599 = vsyncpa [#allocation6], 1 }
 0x562   :  { %1601 = vsyncpa [#allocation6 + $0x1], 1 }
 0x563   :  { %1602 = vsyncpa [#allocation9], 1 }
 0x564   :  { %1603 = vsyncpa [#allocation12], 1 }
 0x565   :  { %1604 = vsyncpa [#allocation4], 1 }
 0x566   :  { %1606 = vsyncpa [#allocation4 + $0x1], 1 }

// kernel: nonlocal_forward.2
= control target key start
LH: loop header
LB: loop body
LE: loop exit
PB: predicated region body
PF: predicated region fallthrough
CT: control target
= control target key end

     0   :  { %10 = vsyncpa [#allocation3], 0  ;;  %s2017_s0 = inlined_call_operand.hbm [shape: f32[2,4,64,4], index: 0, kind: input, shape index: {}]   ;;  %s2018_s1 = inlined_call_operand.hbm [shape: f32[4,4], index: 1, kind: input, shape index: {}]   ;;  %s2019_s2 = inlined_call_operand.hbm [shape: f32[1,4], index: 2, kind: input, shape index: {}]   ;;  %s2020_s3 = inlined_call_operand.hbm [shape: f32[2,64,2], index: 3, kind: output, shape index: {0}]   ;;  %s2021_s4 = inlined_call_operand.hbm [shape: f32[2,64,2], index: 4, kind: output, shape index: {1}]  }
   0x1   :  { %12 = vsyncpa [#allocation3 + $0x1], 0 }
   0x2   :  { %13 = vsyncpa [#allocation6], 0 }
   0x3   :  { %14 = vsyncpa [#allocation4], 0 }
   0x4   :  { %16 = vsyncpa [#allocation4 + $0x1], 0 }
   0x5   :  { %17 = vsyncpa [#allocation10], 0 }
   0x6   :  { %19 = vsyncpa [#allocation10 + $0x1], 0  ;;  %s1613_s15 = smov 0   ;;  %s1615_s16 = smov 0  }
   0x7   :  { %s1617_s17 = smov 0   ;;  %s1619_s18 = smov 0  }
   0x8   :  { %s1621_s19 = smov 0   ;;  %s1623_s20 = smov 0  }
   0x9 LB: > { %s1100_s21 = sadd.s32 4294967295, %s1576_s20   ;;  %s1101_s22 = sadd.s32 4294967294, %s1576_s20   ;;  %s1576_s20 = sphi %s1623_s20, %s25_s20   ;;  %s1572_s19 = sphi %s1621_s19, %s2047_s19   ;;  %s1568_s18 = sphi %s1619_s18, %s2046_s18   ;;  %s1564_s17 = sphi %s1617_s17, %s2045_s17   ;;  %s1560_s16 = sphi %s1615_s16, %s2044_s16   ;;  %s1556_s15 = sphi %s1613_s15, %s2043_s15  }
   0xa   : > { %s46_s23 = sadd.s32 1, %s1564_s17  ;;  %p53_p0 = scmp.ne.s32.totalorder %s1564_s17, %s1560_s16 }
   0xb   : > { %p54_p1 = scmp.eq.s32.totalorder %s1576_s20, 0  ;;  %p59_p2 = scmp.ne.s32.totalorder %s1560_s16, %s1556_s15 }
   0xc   : > { %p1651_p3 = scmp.eq.s32.totalorder %s1100_s21, 0  ;;  %p127_p4 = scmp.eq.s32.totalorder %s1100_s21, 1 }
   0xd   : > { %p1655_p5 = por %p54_p1, %p53_p0  ;;  %p133_p6 = scmp.eq.s32.totalorder %s1101_s22, 1 }
   0xe   : > { %s2028_s24 = scalar_select %p1651_p3, 1, 0 }
   0xf   : > { %p1661_p7 = por %p1651_p3, %p59_p2  ;;  %p1665_p8 = por %p127_p4, %p53_p0 }
  0x10   : > { %p1669_p9 = por %p133_p6, %p59_p2  ;;  %p1102_p10 = scmp.ge.s32.totalorder %s1576_s20, 1 }
  0x11   : > { %s2030_s26 = scalar_select %p1661_p7, 1, 0 }
  0x12   : > { %s2031_s27 = scalar_select %p1665_p8, 1, 0 }
  0x13   : > { %s2032_s28 = scalar_select %p1669_p9, 1, 0 }
  0x14   : > { %p168_p11 = scmp.lt.s32.totalorder %s1576_s20, 3  ;;  %s1578_s30 = smov [#allocation5]  }
  0x15   : > { %s181_s5 = sshll.u32 %s1578_s30, 4  ;;  %p1313_p1 = scmp.lt.s32.totalorder %s1576_s20, 2  ;;  %s182_s5 = int_to_ptr.vmem [resolvable:$true] %s181_s5 }
  0x16   : > { %p1676_p13 = pnand %p1102_p10, %p168_p11  ;;  %s1579_s7 = smov [#allocation7]  }
  0x17   : > { %p1685_p4 = pnand %p1313_p1, %p1655_p5  ;;  %s192_s8 = sshll.u32 %s1579_s7, 4  ;;  %s1695_s8 = int_to_ptr.vmem [resolvable:$true] %s192_s8 }
  0x18   : > { %s2033_s29 = scalar_select %p1676_p13, 1, 0 }
  0x19   : > { %p1293_p0 = pneg %p1676_p13  ;;  %s1372_s12 = scalar_lea.hbm %s2018_s1, 64 }
  0x1a   : > { %s2034_s6 = scalar_select %p1685_p4, 1, 0 }
  0x1b   : > { %p1691_p2 = pnand %p1293_p0, %p1651_p3  ;;  %p1373_p5 = scmp.ne.s32.totalorder %s2018_s1, %s1372_s12 }
  0x1c   : > { %p1379_p1 = scmp.lt.u32.totalorder %s1372_s12, %s2018_s1 }
  0x1d   : > { %p1374_p6 = pneg %p1691_p2 }
  0x1f   : > { %p1375_p10 = pnand %p1374_p6, %p1373_p5 }
  0x21   : > { %p1376_p11 = pneg %p1375_p10 }
  0x23   : > { %p1381_p0 = pnand %p1379_p1, %p1376_p11 }
  0x25   : > { %1384 = shalt.err (!%p1381_p0)
}
  0x26   : > { %s1385_s25 = scalar_lea.vmem %s182_s5, 64  ;;  %p1393_p3 = scmp.lt.s32.totalorder %s182_s5, %s182_s5 }
  0x27   : > { %p1386_p12 = scmp.ne.s32.totalorder %s182_s5, %s1385_s25  ;;  %p1394_p7 = scmp.lt.s32.totalorder %s1385_s25, %s1385_s25 }
  0x29   : > { %p1388_p9 = pnand %p1386_p12, %p1374_p6  ;;  %p1395_p13 = por %p1394_p7, %p1393_p3 }
  0x2b   : > { %p1389_p8 = pneg %p1388_p9 }
  0x2d   : > { %p1396_p4 = pnand %p1395_p13, %p1389_p8 }
  0x2f   : > { %1399 = shalt.err (!%p1396_p4)
}
  0x30   : > { %1296 = dma.hbm_to_vmem [thread:$0]  (!%p1691_p2), %s2018_s1, 64, %s182_s5, [#allocation6]  }
  0x31   : > { %s1400_s12 = scalar_lea.hbm %s2019_s2, 16 }
  0x32   : > { %p1401_p9 = scmp.ne.s32.totalorder %s2019_s2, %s1400_s12  ;;  %p1407_p8 = scmp.lt.u32.totalorder %s1400_s12, %s2019_s2 }
  0x34   : > { %p1403_p3 = pnand %p1401_p9, %p1374_p6 }
  0x36   : > { %p1404_p7 = pneg %p1403_p3 }
  0x38   : > { %p1409_p12 = pnand %p1407_p8, %p1404_p7 }
  0x3a   : > { %1412 = shalt.err (!%p1409_p12)
}
  0x3b   : > { %s1413_s5 = scalar_lea.vmem %s1695_s8, 16  ;;  %s1420_s25 = scalar_lea.vmem %s1695_s8, 32 }
  0x3c   : > { %p1414_p13 = scmp.ne.s32.totalorder %s1695_s8, %s1413_s5  ;;  %p1421_p10 = scmp.lt.s32.totalorder %s1695_s8, %s1695_s8 }
  0x3d   : > { %p1422_p11 = scmp.lt.s32.totalorder %s1420_s25, %s1413_s5 }
  0x3e   : > { %p1416_p4 = pnand %p1414_p13, %p1374_p6 }
  0x3f   : > { %p1423_p1 = por %p1422_p11, %p1421_p10 }
  0x40   : > { %p1417_p5 = pneg %p1416_p4 }
  0x42   : > { %p1424_p0 = pnand %p1423_p1, %p1417_p5 }
  0x44   : > { %1427 = shalt.err (!%p1424_p0)
}
  0x45   : > { %1299 = dma.hbm_to_vmem [thread:$0]  (!%p1691_p2), %s2019_s2, 16, %s1695_s8, [#allocation6]  }
  0x46   : > { %s37_s10 = sadd.s32 1, %s1572_s19  ;;  %s203_s11 = sand.u32 1, %s1564_s17  }
  0x47   : > { %p39_p6 = scmp.ge.s32.totalorder %s37_s10, 2  ;;  %s1106_s12 = sshll.u32 %s203_s11, 8 }
  0x48   : > { %s1184_s13 = sshll.u32 %s1572_s19, 12  ;;  %s207_s8 = scalar_lea.vmem [#allocation2], %s1106_s12 }
  0x49   : > { %s2049_s10 = smov (%p39_p6, %s37_s10), 0  ;;  %s1753_s21 = scalar_lea.hbm %s2017_s0, %s1184_s13 }
  0x4a   : > { %s41_s22 = ssub.s32 %s1572_s19, %s2049_s10  ;;  %s216_s5 = sshll.u32 %s207_s8, 4  ;;  %s1757_s5 = int_to_ptr.vmem [resolvable:$true] %s216_s5 }
  0x4b   : > { %p44_p2 = scmp.eq.s32.totalorder %s41_s22, 0  ;;  %s1764_s30 = scalar_lea.sflag [#allocation3], %s203_s11 }
  0x4c   : > { %s1428_s7 = scalar_lea.hbm %s1753_s21, 4096  ;;  %p2036_p3 = scmp.ne.s32.totalorder %s2034_s6, 0 }
  0x4d   : > { %s1762_s25 = scalar_select %p44_p2, %s1564_s17, %s46_s23  }
  0x4e   : > { %p1429_p9 = scmp.ne.s32.totalorder %s1753_s21, %s1428_s7  ;;  %p1430_p7 = pneg %p2036_p3 }
  0x4f   : > { %s1433_s12 = scalar_lea.hbm %s2017_s0, 8192  ;;  %p1434_p13 = scmp.lt.u32.totalorder %s1753_s21, %s2017_s0 }
  0x50   : > { %p1431_p8 = pnand %p1430_p7, %p1429_p9  ;;  %p1435_p4 = scmp.lt.u32.totalorder %s1433_s12, %s1428_s7 }
  0x51   : > { %p1437_p10 = scmp.lt.u32.totalorder %s1428_s7, %s1753_s21 }
  0x52   : > { %p1432_p12 = pneg %p1431_p8  ;;  %p1436_p5 = por %p1435_p4, %p1434_p13 }
  0x54   : > { %p1438_p11 = por %p1437_p10, %p1436_p5 }
  0x56   : > { %p1439_p1 = pnand %p1438_p11, %p1432_p12 }
  0x58   : > { %1442 = shalt.err (!%p1439_p1)
}
  0x59   : > { %s1443_s23 = scalar_lea.vmem %s1757_s5, 4096  ;;  %s1580_s11 = smov [#allocation2]  }
  0x5a   : > { %p1444_p0 = scmp.ne.s32.totalorder %s1757_s5, %s1443_s23  ;;  %s1448_s8 = sshll.u32 %s1580_s11, 4  ;;  %s1449_s8 = int_to_ptr.vmem [resolvable:$false] %s1448_s8 }
  0x5b   : > { %s1450_s13 = scalar_lea.vmem %s1449_s8, 8192  ;;  %p1451_p9 = scmp.lt.s32.totalorder %s1757_s5, %s1449_s8 }
  0x5c   : > { %p1446_p6 = pnand %p1444_p0, %p1430_p7  ;;  %p1452_p8 = scmp.lt.s32.totalorder %s1450_s13, %s1443_s23 }
  0x5e   : > { %p1447_p2 = pneg %p1446_p6  ;;  %p1453_p13 = por %p1452_p8, %p1451_p9 }
  0x60   : > { %p1454_p4 = pnand %p1453_p13, %p1447_p2 }
  0x62   : > { %1457 = shalt.err (!%p1454_p4)
}
  0x63   : > { %s1581_s7 = smov 128   ;;  %s1582_s9 = smov 8  }
  0x64   : > { %1303 = dma.hbm_to_vmem [thread:$0]  (!%p2036_p3), %s1753_s21, 4096, %s1757_s5, %s1764_s30, %s1581_s7, %s1581_s7, %s1582_s9  }
  0x65   : > { %p2037_p7 = scmp.ne.s32.totalorder %s2033_s29, 0 }
  0x66   : > { %s1795_s12 = sand.u32 (!%p2037_p7), 1, %s1560_s16   ;;  %p2038_p12 = scmp.ne.s32.totalorder (!%p2037_p7), %s2030_s26, 0 }
  0x67   : > { %228 = sbr.rel (%p2037_p7) target bundleno = 507 (0x1fb), region = 32  ;;  %s1110_s14 = sshll.u32 (!%p2037_p7), %s1795_s12, 8 }
  0x68   : > { %s231_s22 = scalar_lea.sflag (!%p2037_p7), [#allocation3], %s1795_s12  ;;  %s1799_s23 = scalar_lea.vmem (!%p2037_p7), [#allocation2], %s1110_s14 }
  0x6e   : > { %1539 = dma.done.wait (%p2038_p12), %s231_s22, 4096  }
  0x6f   : > { %1541 = vsyncadd (%p2038_p12), %s231_s22, 4294963200  ;;  %p2039_p3 = scmp.ne.s32.totalorder %s2028_s24, 0 }
  0x71   : > { %1543 = dma.done.wait (%p2039_p3), [#allocation6], 80  }
  0x72   : > { %1545 = vsyncadd (%p2039_p3), [#allocation6], 4294967216  ;;  %vm309_vm0 = vcmask 1043456   ;;  %vm284_vm1 = vcmask 31744   ;;  %v275_v0 = vld [vmem:[#allocation5] sm:$0xf] }
  0x73   : > { %v276_v1 = vld [vmem:[%s1799_s23] sm:$0xff]  ;;  %1223 = vmatprep.subr.msk.mxu0 %vm309_vm0, %v275_v0  ;;  %1237 = vmatprep.subr.msk.mxu1 %vm309_vm0, %v275_v0  ;;  %v277_v3 = vld [vmem:[%s1799_s23 + $0x8] sm:$0xff]  ;;  %v278_v5 = vld [vmem:[%s1799_s23 + $0x10] sm:$0xff]  ;;  %s1113_s24 = sshll.u32 %s1795_s12, 6  ;;  %vm871_vm2 = vcmask 15360   ;;  %s1583_s26 = smov 126  }
  0x74   : > { %v1124_v2 = vld [vmem:[%s1799_s23 + $0x40] sm:$0xff]  ;;  %v1125_v4 = vld [vmem:[%s1799_s23 + $0x48] sm:$0xff]  ;;  %1224 = vmatpush3.msk.msra.mxu0 %vm309_vm0, %v275_v0  ;;  %1225 = vmatprep.mubr.msk.f32.mxu0 %vm284_vm1, %v276_v1  ;;  %v1126_v6 = vld [vmem:[%s1799_s23 + $0x50] sm:$0xff]  ;;  %s1885_s29 = scalar_lea.vmem [#allocation8], %s1113_s24  ;;  %s1185_s6 = sshll.u32 %s1568_s18, 10 }
  0x75   : > { %1238 = vmatpush3.msk.msra.mxu1 %vm309_vm0, %v275_v0  ;;  %1239 = vmatprep.mubr.msk.f32.mxu1 %vm284_vm1, %v1124_v2  ;;  %v279_v7 = vld [vmem:[%s1799_s23 + $0x18] sm:$0xff]  ;;  %v280_v9 = vld [vmem:[%s1799_s23 + $0x20] sm:$0xff]  ;;  %v281_v11 = vld [vmem:[%s1799_s23 + $0x28] sm:$0xff]  ;;  %s941_s21 = sshll.u32 %s1885_s29, 4  ;;  %s1910_s11 = scalar_lea.hbm %s2020_s3, %s1185_s6  ;;  %s1912_s21 = int_to_ptr.vmem [resolvable:$true] %s941_s21 }
  0x76   : > { %1226 = vmatmul.mubr.msk.f32.vlgmr.msra.gmra.mrb[0].mxu0 %vm284_vm1, %v277_v3  ;;  %1240 = vmatmul.mubr.msk.f32.vlgmr.msra.gmra.mrb[0].mxu1 %vm284_vm1, %v1125_v4  ;;  %v1127_v8 = vld [vmem:[%s1799_s23 + $0x58] sm:$0xff]  ;;  %v1128_v10 = vld [vmem:[%s1799_s23 + $0x60] sm:$0xff]  ;;  %v1129_v12 = vld [vmem:[%s1799_s23 + $0x68] sm:$0xff]  ;;  %s921_s8 = scalar_lea.sflag [#allocation4], %s1795_s12  ;;  %s1458_s13 = scalar_lea.vmem %s1912_s21, 1024 }
  0x77   : > { %1251 = vmatprep.subr.msk.mxu0 %vm309_vm0, %v275_v0  ;;  %1265 = vmatprep.subr.msk.mxu1 %vm309_vm0, %v275_v0  ;;  %v282_v13 = vld [vmem:[%s1799_s23 + $0x30] sm:$0xff]  ;;  %v283_v15 = vld [vmem:[%s1799_s23 + $0x38] sm:$0xff]  ;;  %v1141_v17 = vld [vmem:[%s1799_s23 + $0x80] sm:$0xff]  ;;  %p1459_p5 = scmp.ne.s32.totalorder %s1912_s21, %s1458_s13  ;;  %p2040_p10 = scmp.ne.s32.totalorder %s2031_s27, 0 }
  0x78   : > { %1252 = vmatpush3.msk.msra.mxu0 %vm309_vm0, %v275_v0  ;;  %1266 = vmatpush3.msk.msra.mxu1 %vm309_vm0, %v275_v0  ;;  %v1130_v14 = vld [vmem:[%s1799_s23 + $0x70] sm:$0xff]  ;;  %v1131_v16 = vld [vmem:[%s1799_s23 + $0x78] sm:$0xff]  ;;  %v1158_v18 = vld [vmem:[%s1799_s23 + $0xc0] sm:$0xff]  ;;  %s1584_s7 = smov [#allocation8]  }
  0x79   : > { %1228 = vmatprep.mubr.msk.f32.mxu0 %vm284_vm1, %v278_v5  ;;  %1242 = vmatprep.mubr.msk.f32.mxu1 %vm284_vm1, %v1126_v6  ;;  %v1142_v19 = vld [vmem:[%s1799_s23 + $0x88] sm:$0xff]  ;;  %v1143_v21 = vld [vmem:[%s1799_s23 + $0x90] sm:$0xff]  ;;  %v1144_v23 = vld [vmem:[%s1799_s23 + $0x98] sm:$0xff]  ;;  %p1460_p11 = pnand %p1459_p5, %p2040_p10  ;;  %s1462_s9 = sshll.u32 %s1584_s7, 4  ;;  %s1463_s9 = int_to_ptr.vmem [resolvable:$false] %s1462_s9 }
  0x7a   : > { %1229 = vmatmul.mubr.msk.f32.gmra.mrb[2].mxu0 %vm284_vm1, %v279_v7  ;;  %1243 = vmatmul.mubr.msk.f32.gmra.mrb[2].mxu1 %vm284_vm1, %v1127_v8  ;;  %v1159_v20 = vld [vmem:[%s1799_s23 + $0xc8] sm:$0xff]  ;;  %v1160_v22 = vld [vmem:[%s1799_s23 + $0xd0] sm:$0xff]  ;;  %v1161_v24 = vld [vmem:[%s1799_s23 + $0xd8] sm:$0xff]  ;;  %s1464_s14 = scalar_lea.vmem %s1463_s9, 2048  ;;  %p1465_p0 = scmp.lt.s32.totalorder %s1912_s21, %s1463_s9 }
  0x7b   : > { %1231 = vmatprep.mubr.msk.f32.mxu0 %vm284_vm1, %v280_v9  ;;  %1245 = vmatprep.mubr.msk.f32.mxu1 %vm284_vm1, %v1128_v10  ;;  %v1145_v25 = vld [vmem:[%s1799_s23 + $0xa0] sm:$0xff]  ;;  %v1146_v27 = vld [vmem:[%s1799_s23 + $0xa8] sm:$0xff]  ;;  %v1147_v29 = vld [vmem:[%s1799_s23 + $0xb0] sm:$0xff]  ;;  %p1461_p1 = pneg %p1460_p11  ;;  %p1466_p6 = scmp.lt.s32.totalorder %s1464_s14, %s1458_s13 }
  0x7c   : > { %v1162_v26 = vld [vmem:[%s1799_s23 + $0xe0] sm:$0xff]  ;;  %v1163_v28 = vld [vmem:[%s1799_s23 + $0xe8] sm:$0xff]  ;;  %v1164_v30 = vld [vmem:[%s1799_s23 + $0xf0] sm:$0xff] }
  0x7d   : > { %v1148_v31 = vld [vmem:[%s1799_s23 + $0xb8] sm:$0xff]  ;;  %v1175_v63 = vld [vmem:[#allocation7] ss:$0 sm:$0xff]  ;;  %p1467_p2 = por %p1466_p6, %p1465_p0 }
  0x7e   : > { %1232 = vmatmul.mubr.msk.f32.gmra.mrb[4].mxu0 %vm284_vm1, %v281_v11  ;;  %1246 = vmatmul.mubr.msk.f32.gmra.mrb[4].mxu1 %vm284_vm1, %v1129_v12  ;;  %v1165_v32 = vld [vmem:[%s1799_s23 + $0xf8] sm:$0xff] }
  0x7f   : > { %1234 = vmatprep.mubr.msk.f32.mxu0 %vm284_vm1, %v282_v13  ;;  %1248 = vmatprep.mubr.msk.f32.mxu1 %vm284_vm1, %v1130_v14  ;;  %p1468_p9 = pnand %p1467_p2, %p1461_p1 }
  0x82   : > { %1235 = vmatmul.mubr.msk.f32.gmra.mrb[6].mxu0 %vm284_vm1, %v283_v15  ;;  %1249 = vmatmul.mubr.msk.f32.gmra.mrb[6].mxu1 %vm284_vm1, %v1131_v16 }
  0x83   : > { %1253 = vmatprep.mubr.msk.f32.mxu0 %vm284_vm1, %v1141_v17  ;;  %1267 = vmatprep.mubr.msk.f32.mxu1 %vm284_vm1, %v1158_v18 }
  0x86   : > { %1254 = vmatmul.mubr.msk.f32.vlgmr.msra.gmra.mrb[8].mxu0 %vm284_vm1, %v1142_v19  ;;  %1268 = vmatmul.mubr.msk.f32.vlgmr.msra.gmra.mrb[8].mxu1 %vm284_vm1, %v1159_v20 }
  0x87   : > { %1256 = vmatprep.mubr.msk.f32.mxu0 %vm284_vm1, %v1143_v21  ;;  %1270 = vmatprep.mubr.msk.f32.mxu1 %vm284_vm1, %v1160_v22 }
  0x8a   : > { %1257 = vmatmul.mubr.msk.f32.gmra.mrb[10].mxu0 %vm284_vm1, %v1144_v23  ;;  %1271 = vmatmul.mubr.msk.f32.gmra.mrb[10].mxu1 %vm284_vm1, %v1161_v24 }
  0x8b   : > { %1259 = vmatprep.mubr.msk.f32.mxu0 %vm284_vm1, %v1145_v25  ;;  %1273 = vmatprep.mubr.msk.f32.mxu1 %vm284_vm1, %v1162_v26 }
  0x8e   : > { %1260 = vmatmul.mubr.msk.f32.gmra.mrb[12].mxu0 %vm284_vm1, %v1146_v27  ;;  %1274 = vmatmul.mubr.msk.f32.gmra.mrb[12].mxu1 %vm284_vm1, %v1163_v28 }
  0x8f   : > { %1262 = vmatprep.mubr.msk.f32.mxu0 %vm284_vm1, %v1147_v29  ;;  %1276 = vmatprep.mubr.msk.f32.mxu1 %vm284_vm1, %v1164_v30 }
  0x92   : > { %1263 = vmatmul.mubr.msk.f32.gmra.mrb[14].mxu0 %vm284_vm1, %v1148_v31  ;;  %1277 = vmatmul.mubr.msk.f32.gmra.mrb[14].mxu1 %vm284_vm1, %v1165_v32 }
 0x149   : > { %v1227_v33 = vpop.f32.mrb[0].mxu0  ;;  %v1241_v34 = vpop.f32.mrb[0].mxu1 }
 0x14a   : > { %v557_v35 = vmax.f32 %v1227_v33, %v1241_v34  ;;  %v379_v36 = vpop.f32.mrb[1].mxu0  ;;  %v517_v37 = vpop.f32.mrb[1].mxu1 }
 0x14b   : > { %v556_v38 = vmax.f32 %v379_v36, %v517_v37 }
 0x14d   : > { %v1230_v39 = vpop.f32.mrb[2].mxu0  ;;  %v1244_v40 = vpop.f32.mrb[2].mxu1 }
 0x14e   : > { %v559_v41 = vmax.f32 %v1230_v39, %v1244_v40  ;;  %v389_v42 = vpop.f32.mrb[3].mxu0  ;;  %v527_v43 = vpop.f32.mrb[3].mxu1 }
 0x14f   : > { %v558_v44 = vmax.f32 %v389_v42, %v527_v43 }
 0x151   : > { %v1233_v45 = vpop.f32.mrb[4].mxu0  ;;  %v1247_v46 = vpop.f32.mrb[4].mxu1 }
 0x152   : > { %v561_v47 = vmax.f32 %v1233_v45, %v1247_v46  ;;  %v399_v48 = vpop.f32.mrb[5].mxu0  ;;  %v537_v49 = vpop.f32.mrb[5].mxu1 }
 0x153   : > { %v560_v50 = vmax.f32 %v399_v48, %v537_v49 }
 0x155   : > { %v1236_v51 = vpop.f32.mrb[6].mxu0  ;;  %v1250_v52 = vpop.f32.mrb[6].mxu1 }
 0x156   : > { %v563_v53 = vmax.f32 %v1236_v51, %v1250_v52  ;;  %v409_v54 = vpop.f32.mrb[7].mxu0  ;;  %v547_v55 = vpop.f32.mrb[7].mxu1 }
 0x157   : > { %v562_v56 = vmax.f32 %v409_v54, %v547_v55 }
 0x159   : > { %v1255_v57 = vpop.f32.mrb[8].mxu0  ;;  %v1269_v58 = vpop.f32.mrb[8].mxu1 }
 0x15a   : > { %v841_v59 = vmax.f32 %v1255_v57, %v1269_v58  ;;  %v663_v60 = vpop.f32.mrb[9].mxu0  ;;  %v801_v61 = vpop.f32.mrb[9].mxu1 }
 0x15b   : > { %v840_v62 = vmax.f32 %v663_v60, %v801_v61 }
 0x15c   : > { %v849_v0 = vmax.f32 %v557_v35, %v841_v59 }
 0x15d   : > { %v848_v1 = vmax.f32 %v556_v38, %v840_v62  ;;  %v1258_v2 = vpop.f32.mrb[10].mxu0  ;;  %v1272_v3 = vpop.f32.mrb[10].mxu1 }
 0x15e   : > { %v843_v4 = vmax.f32 %v1258_v2, %v1272_v3  ;;  %v673_v5 = vpop.f32.mrb[11].mxu0  ;;  %v811_v6 = vpop.f32.mrb[11].mxu1  ;;  %v864_v7 = vadd.f32 %v1175_v63, %v849_v0 }
 0x15f   : > { %v842_v8 = vmax.f32 %v673_v5, %v811_v6  ;;  %v863_v9 = vadd.f32 %v1175_v63, %v848_v1 }
 0x160   : > { %v851_v10 = vmax.f32 %v559_v41, %v843_v4  ;;  %890 = vrot.lane.b32.xlu0 %v864_v7, %s1583_s26  ;;  %873 = vst.msk [vmem:[%s1885_s29 + $0x8] sm:$0xff] %vm871_vm2, %v864_v7 }
 0x161   : > { %v850_v11 = vmax.f32 %v558_v44, %v842_v8  ;;  %v1261_v12 = vpop.f32.mrb[12].mxu0  ;;  %v1275_v13 = vpop.f32.mrb[12].mxu1  ;;  %872 = vst.msk [vmem:[%s1885_s29] sm:$0xff] %vm871_vm2, %v863_v9 }
 0x162   : > { %v845_v14 = vmax.f32 %v1261_v12, %v1275_v13  ;;  %v683_v15 = vpop.f32.mrb[13].mxu0  ;;  %v821_v16 = vpop.f32.mrb[13].mxu1  ;;  %v866_v17 = vadd.f32 %v1175_v63, %v851_v10 }
 0x163   : > { %v844_v18 = vmax.f32 %v683_v15, %v821_v16  ;;  %v865_v19 = vadd.f32 %v1175_v63, %v850_v11 }
 0x164   : > { %v853_v20 = vmax.f32 %v561_v47, %v845_v14  ;;  %888 = vrot.lane.b32.xlu0 %v863_v9, %s1583_s26  ;;  %894 = vrot.lane.b32.xlu1 %v866_v17, %s1583_s26  ;;  %875 = vst.msk [vmem:[%s1885_s29 + $0x18] sm:$0xff] %vm871_vm2, %v866_v17 }
 0x165   : > { %v852_v21 = vmax.f32 %v560_v50, %v844_v18  ;;  %v1264_v22 = vpop.f32.mrb[14].mxu0  ;;  %v1278_v23 = vpop.f32.mrb[14].mxu1  ;;  %874 = vst.msk [vmem:[%s1885_s29 + $0x10] sm:$0xff] %vm871_vm2, %v865_v19 }
 0x166   : > { %v847_v24 = vmax.f32 %v1264_v22, %v1278_v23  ;;  %v693_v25 = vpop.f32.mrb[15].mxu0  ;;  %v831_v26 = vpop.f32.mrb[15].mxu1  ;;  %v868_v27 = vadd.f32 %v1175_v63, %v853_v20 }
 0x167   : > { %v846_v28 = vmax.f32 %v693_v25, %v831_v26  ;;  %v867_v29 = vadd.f32 %v1175_v63, %v852_v21 }
 0x168   : > { %v855_v30 = vmax.f32 %v563_v53, %v847_v24  ;;  %892 = vrot.lane.b32.xlu1 %v865_v19, %s1583_s26  ;;  %877 = vst.msk [vmem:[%s1885_s29 + $0x28] sm:$0xff] %vm871_vm2, %v868_v27 }
 0x169   : > { %v854_v31 = vmax.f32 %v562_v56, %v846_v28  ;;  %896 = vrot.lane.b32.xlu0 %v867_v29, %s1583_s26  ;;  %876 = vst.msk [vmem:[%s1885_s29 + $0x20] sm:$0xff] %vm871_vm2, %v867_v29 }
 0x16a   : > { %v870_v32 = vadd.f32 %v1175_v63, %v855_v30 }
 0x16b   : > { %v869_v33 = vadd.f32 %v1175_v63, %v854_v31 }
 0x16c   : > { %898 = vrot.lane.b32.xlu1 %v868_v27, %s1583_s26  ;;  %879 = vst.msk [vmem:[%s1885_s29 + $0x38] sm:$0xff] %vm871_vm2, %v870_v32 }
 0x16d   : > { %900 = vrot.lane.b32.xlu0 %v869_v33, %s1583_s26  ;;  %878 = vst.msk [vmem:[%s1885_s29 + $0x30] sm:$0xff] %vm871_vm2, %v869_v33 }
 0x16e   : > { %1471 = shalt.err (!%p1468_p9)
}
 0x16f   : > { %s1472_s22 = scalar_lea.hbm %s1910_s11, 1024  ;;  %s1476_s5 = scalar_lea.hbm %s2020_s3, 2048 }
 0x170   : > { %p1473_p8 = scmp.ne.s32.totalorder %s1910_s11, %s1472_s22  ;;  %p1477_p7 = scmp.lt.u32.totalorder %s1910_s11, %s2020_s3 }
 0x171   : > { %p1478_p12 = scmp.lt.u32.totalorder %s1476_s5, %s1472_s22  ;;  %p1480_p5 = scmp.lt.u32.totalorder %s1472_s22, %s1910_s11 }
 0x172   : > { %p1474_p13 = pnand %p1473_p8, %p2040_p10 }
 0x173   : > { %p1479_p3 = por %p1478_p12, %p1477_p7 }
 0x174   : > { %p1475_p4 = pneg %p1474_p13 }
 0x175   : > { %p1481_p11 = por %p1480_p5, %p1479_p3 }
 0x177   : > { %p1482_p1 = pnand %p1481_p11, %p1475_p4 }
 0x179   : > { %1485 = shalt.err (!%p1482_p1)
}
 0x17a   : > { %s1585_s13 = smov 128   ;;  %s1586_s9 = smov 8   ;;  %902 = vrot.lane.b32.xlu1 %v870_v32, %s1583_s26 }
 0x17b   : > { %1289 = dma.vmem_to_hbm [thread:$0]  (%p2040_p10), %s1912_s21, 1024, %s1910_s11, %s921_s8, %s1585_s13, %s1585_s13, %s1586_s9  }
 0x17c   : > { %s271_s14 = scalar_lea.vmem [#allocation9], %s1113_s24  ;;  %s1964_s11 = scalar_lea.hbm %s2021_s4, %s1185_s6 }
 0x17d   : > { %s959_s26 = sshll.u32 %s271_s14, 4  ;;  %s926_s8 = scalar_lea.sflag [#allocation10], %s1795_s12  ;;  %s1956_s26 = int_to_ptr.vmem [resolvable:$true] %s959_s26 }
 0x17e   : > { %s1486_s22 = scalar_lea.vmem %s1956_s26, 1024  ;;  %s1587_s23 = smov [#allocation9]  }
 0x17f   : > { %p1487_p0 = scmp.ne.s32.totalorder %s1956_s26, %s1486_s22  ;;  %s1490_s29 = sshll.u32 %s1587_s23, 4  ;;  %s1491_s29 = int_to_ptr.vmem [resolvable:$false] %s1490_s29 }
 0x180   : > { %s1492_s5 = scalar_lea.vmem %s1491_s29, 2048  ;;  %p1493_p9 = scmp.lt.s32.totalorder %s1956_s26, %s1491_s29 }
 0x181   : > { %p1488_p6 = pnand %p1487_p0, %p2040_p10  ;;  %p1494_p8 = scmp.lt.s32.totalorder %s1492_s5, %s1486_s22 }
 0x183   : > { %p1489_p2 = pneg %p1488_p6  ;;  %p1495_p13 = por %p1494_p8, %p1493_p9 }
 0x185   : > { %p1496_p4 = pnand %p1495_p13, %p1489_p2 }
 0x1d2   : > { %v891_v34 = vpop.permute.xlu0 %890 }
 0x1d3   : > { %913 = vst.msk [vmem:[%s271_s14 + $0x8] sm:$0xff] %vm871_vm2, %v891_v34 }
 0x1d6   : > { %v889_v35 = vpop.permute.xlu0 %888  ;;  %v895_v36 = vpop.permute.xlu1 %894 }
 0x1d7   : > { %912 = vst.msk [vmem:[%s271_s14] sm:$0xff] %vm871_vm2, %v889_v35  ;;  %915 = vst.msk [vmem:[%s271_s14 + $0x18] sm:$0xff] %vm871_vm2, %v895_v36 }
 0x1da   : > { %v893_v37 = vpop.permute.xlu1 %892 }
 0x1db   : > { %914 = vst.msk [vmem:[%s271_s14 + $0x10] sm:$0xff] %vm871_vm2, %v893_v37  ;;  %v897_v38 = vpop.permute.xlu0 %896 }
 0x1dc   : > { %916 = vst.msk [vmem:[%s271_s14 + $0x20] sm:$0xff] %vm871_vm2, %v897_v38 }
 0x1de   : > { %v899_v39 = vpop.permute.xlu1 %898 }
 0x1df   : > { %917 = vst.msk [vmem:[%s271_s14 + $0x28] sm:$0xff] %vm871_vm2, %v899_v39  ;;  %v901_v40 = vpop.permute.xlu0 %900 }
 0x1e0   : > { %918 = vst.msk [vmem:[%s271_s14 + $0x30] sm:$0xff] %vm871_vm2, %v901_v40 }
 0x1ec   : > { %v903_v41 = vpop.permute.xlu1 %902 }
 0x1ed   : > { %919 = vst.msk [vmem:[%s271_s14 + $0x38] sm:$0xff] %vm871_vm2, %v903_v41 }
 0x1ee   : > { %1499 = shalt.err (!%p1496_p4)
}
 0x1ef   : > { %s1500_s18 = scalar_lea.hbm %s1964_s11, 1024  ;;  %s1504_s7 = scalar_lea.hbm %s2021_s4, 2048 }
 0x1f0   : > { %p1501_p7 = scmp.ne.s32.totalorder %s1964_s11, %s1500_s18  ;;  %p1505_p5 = scmp.lt.u32.totalorder %s1964_s11, %s2021_s4 }
 0x1f1   : > { %p1506_p11 = scmp.lt.u32.totalorder %s1504_s7, %s1500_s18  ;;  %p1508_p0 = scmp.lt.u32.totalorder %s1500_s18, %s1964_s11 }
 0x1f2   : > { %p1502_p12 = pnand %p1501_p7, %p2040_p10 }
 0x1f3   : > { %p1507_p1 = por %p1506_p11, %p1505_p5 }
 0x1f4   : > { %p1503_p3 = pneg %p1502_p12 }
 0x1f5   : > { %p1509_p6 = por %p1508_p0, %p1507_p1 }
 0x1f7   : > { %p1510_p2 = pnand %p1509_p6, %p1503_p3 }
 0x1f9   : > { %1513 = shalt.err (!%p1510_p2)
}
 0x1fa   : > { %1290 = dma.vmem_to_hbm [thread:$0]  (%p2040_p10), %s1956_s26, 1024, %s1964_s11, %s926_s8, %s1585_s13, %s1585_s13, %s1586_s9  }
 0x1fb PF: > { %s974_s21 = sand.u32 1, %s1556_s15   ;;  %p2041_p9 = scmp.ne.s32.totalorder %s2032_s28, 0 }
 0x1fc   : > { %p2042_p8 = scmp.ge.s32.totalorder %s1576_s20, 2  ;;  %s975_s22 = scalar_lea.sflag [#allocation4], %s974_s21 }
 0x1fe   : > { %p1305_p13 = pnand %p2042_p8, %p2041_p9 }
 0x200   : > { %1547 = dma.done.wait (!%p1305_p13), %s975_s22, 1024  }
 0x201   : > { %1549 = vsyncadd (!%p1305_p13), %s975_s22, 4294966272  ;;  %s984_s27 = scalar_lea.sflag [#allocation10], %s974_s21 }
 0x202   : > { %1551 = dma.done.wait (!%p1305_p13), %s984_s27, 1024  }
 0x203   : > { %1553 = vsyncadd (!%p1305_p13), %s984_s27, 4294966272  ;;  %s25_s20 = sadd.s32 1, %s1576_s20   ;;  %s2043_s15 = smov %s1560_s16 }
 0x204   : > { %p22_p4 = scmp.ge.s32.totalorder %s25_s20, 4   ;;  %s2044_s16 = smov %s1564_s17 }
 0x205   : > { %s2045_s17 = smov %s1762_s25  ;;  %s2046_s18 = smov %s1572_s19 }
 0x206   : > { %s2047_s19 = smov %s2049_s10  ;;  %24 = sbr.rel (!%p22_p4) target bundleno = 9 (0x9), region = 105 }
 0x20d   :  { %989 = vsyncpa [#allocation3], 1 }
 0x20e   :  { %991 = vsyncpa [#allocation3 + $0x1], 1 }
 0x20f   :  { %992 = vsyncpa [#allocation6], 1 }
 0x210   :  { %993 = vsyncpa [#allocation4], 1 }
 0x211   :  { %995 = vsyncpa [#allocation4 + $0x1], 1 }
 0x212   :  { %996 = vsyncpa [#allocation10], 1 }
 0x213   :  { %998 = vsyncpa [#allocation10 + $0x1], 1 }

</bundles_post_ra>
